<compile_context>
chip_gen: v7x
topology: tpu7x:2x2x1
jax: 0.10.0
libtpu: 0.0.40
codegen_flags: <defaults>
</compile_context>

<pallas_src>
import math

import jax
import jax.numpy as jnp
import numpy as np
from jax import lax
from jax.experimental import pallas as pl
from jax.experimental.pallas import tpu as pltpu

# ----------------------------- configuration --------------------------------
BATCH = 8            # L : attention sequence length (PyTorch passes batch here)
IN_DIM = 8           # N : number of features == MHA "batch" dimension
EMB_DIM = 8          # E : embedding_dim
NUM_HEADS = 2
HEAD_DIM = EMB_DIM // NUM_HEADS
OUT_DIM = 4
NUM_BINS = 1100
MN, MX = -1.0, 300.0

NB = IN_DIM * BATCH                 # 64 stacked (feature, obs) rows
NE = IN_DIM * EMB_DIM               # 64 stacked feature columns per q/k/v section
BINS_PAD = 1280                     # bins padded to a multiple of 128 AND 256 (MXU depth)


# --------------------------- shared bucketize -------------------------------
def uniform_bucketize(x):
    """torch.bucketize(clamp(x), linspace(MN, MX, NUM_BINS), right=False) for UNIFORM
    bins: idx = #{j : bins[j] < x} = ceil((clamp(x) - MN) / step).  Exact at the clamp
    endpoints; equal to searchsorted(side='left') everywhere up to fp ties at bin edges."""
    inv_step = (NUM_BINS - 1) / (MX - MN)
    xc = jnp.clip(x, MN, MX)
    t = (xc - jnp.float32(MN)) * jnp.float32(inv_step)
    idx = jnp.ceil(t)
    return jnp.clip(idx, 0.0, NUM_BINS - 1).astype(jnp.int32)


# ------------------------------- kernel --------------------------------------
def make_act_mlp_kernel(batch, in_dim, emb_dim, num_heads, out_dim, bins_pad):
    head_dim = emb_dim // num_heads
    nb = in_dim * batch                 # stacked (feature, obs) rows
    ne = in_dim * emb_dim               # stacked feature columns per section

    def kernel(x_ref, table_ref, mask_ref, wcomb_ref, bcomb_ref, out_ref, onehot_scr):
        # x_ref      : (batch, in_dim)                raw observations (one grid step)
        # table_ref  : (bins_pad, 3*ne)               QKV-folded stacked gather table
        # mask_ref   : (num_heads*nb, nb)             block-diagonal -1e30 mask (per head tile)
        # wcomb_ref  : (ne, out_dim)                  out_proj folded into final linear
        # bcomb_ref  : (1, out_dim)
        # out_ref    : (batch, out_dim)
        # onehot_scr : (nb, bins_pad) VMEM            staged one-hot rows

        # ---- clamp + closed-form uniform bucketize (no searchsorted) -------------
        idx = uniform_bucketize(x_ref[...])                        # (batch, in_dim) i32

        # ---- stage the fused one-hot: full-lane-width (batch, bins_pad) stores ----
        bins_iota = lax.broadcasted_iota(jnp.int32, (batch, bins_pad), 1)
        for n in range(in_dim):                                    # static unroll
            onehot_scr[n * batch:(n + 1) * batch, :] = (
                bins_iota == idx[:, n:n + 1]).astype(jnp.float32)
            # padded bins (>= NUM_BINS) can never match idx -> stay exactly zero

        # ---- ONE gather matmul: (nb, bins_pad) x (bins_pad, 3*ne) on the MXU ------
        # columns: [ q sect (ne) | k sect (ne) | v sect (ne) ], each feature-major.
        full = jnp.dot(onehot_scr[...], table_ref[...],
                       preferred_element_type=jnp.float32)         # (nb, 3*ne)

        # ---- extract diagonal (batch, emb) blocks -> register-resident q, k, v ----
        def gather_section(sec):
            off = sec * ne
            return jnp.concatenate(
                [full[n * batch:(n + 1) * batch,
                      off + n * emb_dim: off + (n + 1) * emb_dim]
                 for n in range(in_dim)], axis=0)                  # (nb, emb_dim)

        q = gather_section(0)      # already bias-added and scaled offline
        k = gather_section(1)      # already bias-added offline
        v = gather_section(2)      # already bias-added offline

        # ---- fused 2-head attention: block-diagonal Q over the head axis ----------
        zeros_h = jnp.zeros((nb, head_dim), jnp.float32)
        q_rows = []
        for h in range(num_heads):                                 # static unroll (2)
            parts = []
            for h2 in range(num_heads):
                if h2 == h:
                    parts.append(q[:, h * head_dim:(h + 1) * head_dim])
                else:
                    parts.append(zeros_h)
            q_rows.append(jnp.concatenate(parts, axis=1))          # (nb, emb_dim)
        q_big = jnp.concatenate(q_rows, axis=0)                    # (num_heads*nb, emb_dim)

        s = lax.dot_general(q_big, k, (((1,), (1,)), ((), ())),
                            preferred_element_type=jnp.float32)    # (num_heads*nb, nb)
        s = s + mask_ref[...]                                      # kill cross-feature scores
        s = s - jnp.max(s, axis=-1, keepdims=True)
        p = jnp.exp(s)
        p = p * pl.reciprocal(jnp.sum(p, axis=-1, keepdims=True), approx=False)
        pv = jnp.dot(p, v, preferred_element_type=jnp.float32)     # (num_heads*nb, emb_dim)

        # per-head outputs live in the matching head-column block of the matching row block
        o = jnp.concatenate(
            [pv[h * nb:(h + 1) * nb, h * head_dim:(h + 1) * head_dim]
             for h in range(num_heads)], axis=1)                   # (nb, emb_dim)

        # ---- folded out_proj + final linear: accumulate logits per feature --------
        acc = jnp.zeros((batch, out_dim), jnp.float32)
        for n in range(in_dim):                                    # static unroll
            acc = acc + jnp.dot(o[n * batch:(n + 1) * batch, :],
                                wcomb_ref[n * emb_dim:(n + 1) * emb_dim, :],
                                preferred_element_type=jnp.float32)
        logits = acc + bcomb_ref[...]

        # ---- output softmax --------------------------------------------------------
        logits = logits - jnp.max(logits, axis=-1, keepdims=True)
        e = jnp.exp(logits)
        out_ref[...] = e * pl.reciprocal(jnp.sum(e, axis=-1, keepdims=True),
                                         approx=False)

    return kernel


# ------------------------------ wrapper ---------------------------------------
@jax.jit
def act_mlp_forward(params, x):
    """x: (G, BATCH, IN_DIM) -- G independent forwards batched over a parallel grid."""
    g = x.shape[0]
    kernel = make_act_mlp_kernel(BATCH, IN_DIM, EMB_DIM, NUM_HEADS, OUT_DIM, BINS_PAD)
    in_specs = [
        pl.BlockSpec((None, BATCH, IN_DIM), lambda i: (i, 0, 0)),          # x: one chunk/step
        pl.BlockSpec((BINS_PAD, 3 * NE), lambda i: (0, 0)),                # table, VMEM-resident
        pl.BlockSpec((NUM_HEADS * NB, NB), lambda i: (0, 0)),              # attention mask
        pl.BlockSpec((NE, OUT_DIM), lambda i: (0, 0)),                     # folded linear
        pl.BlockSpec((1, OUT_DIM), lambda i: (0, 0)),                      # folded bias
    ]
    out_specs = pl.BlockSpec((None, BATCH, OUT_DIM), lambda i: (i, 0, 0))
    return pl.pallas_call(
        kernel,
        out_shape=jax.ShapeDtypeStruct((g, BATCH, OUT_DIM), jnp.float32),
        grid=(g,),
        in_specs=in_specs,
        out_specs=out_specs,
        scratch_shapes=[pltpu.VMEM((NB, BINS_PAD), jnp.float32)],          # staged one-hot
        compiler_params=pltpu.CompilerParams(
            dimension_semantics=("parallel",)),                            # dual-TC on v7x
    )(x, params["table"], params["mask2"], params["w_comb"], params["b_comb"])


# ------------------------------ pure-JAX reference ----------------------------
def reference_forward(params, x):
    """Unfused reference using the raw module weights (single forward, x: (B, IN_DIM))."""
    idx = uniform_bucketize(x)                                     # (B, N)
    x_emb = jax.vmap(lambda tbl, ind: tbl[ind],
                     in_axes=(0, 1), out_axes=1)(params["emb"], idx)  # (B, N, E)
    B, N, E = x_emb.shape
    H, hd = NUM_HEADS, HEAD_DIM
    qkv = jnp.einsum("lne,fe->lnf", x_emb, params["in_proj_w"]) + params["in_proj_b"]
    q, k, v = qkv[..., :E], qkv[..., E:2 * E], qkv[..., 2 * E:]
    q = q * (float(hd) ** -0.5)

    def split(t):                     # (L, N, E) -> (N, H, L, hd)
        return jnp.transpose(t.reshape(B, N, H, hd), (1, 2, 0, 3))

    qh, kh, vh = split(q), split(k), split(v)
    s = jnp.einsum("nhld,nhmd->nhlm", qh, kh)
    p = jax.nn.softmax(s, axis=-1)
    o = jnp.einsum("nhlm,nhmd->nhld", p, vh)
    o = jnp.transpose(o, (2, 0, 1, 3)).reshape(B, N, E)
    attn_out = jnp.einsum("lne,fe->lnf", o, params["out_w"]) + params["out_b"]
    flat = attn_out.reshape(B, N * E)
    logits = flat @ params["lin_w"].T + params["lin_b"]
    return jax.nn.softmax(logits, axis=-1)


# ------------------------------- parameters -----------------------------------
def init_params(key):
    ks = jax.random.split(key, 6)
    E, N, H = EMB_DIM, IN_DIM, NUM_HEADS
    scale = float(HEAD_DIM) ** -0.5
    emb = jax.random.normal(ks[0], (N, NUM_BINS, E), jnp.float32)   # nn.Embedding ~ N(0,1)
    in_proj_w = jax.random.normal(ks[1], (3 * E, E), jnp.float32) / math.sqrt(E)
    in_proj_b = 0.01 * jax.random.normal(ks[2], (3 * E,), jnp.float32)
    out_w = jax.random.normal(ks[3], (E, E), jnp.float32) / math.sqrt(E)
    out_b = jnp.zeros((E,), jnp.float32)
    lin_w = jax.random.normal(ks[4], (OUT_DIM, N * E), jnp.float32) / math.sqrt(N * E)
    lin_b = 0.01 * jax.random.normal(ks[5], (OUT_DIM,), jnp.float32)

    # ---- offline kernel-side precomputes (done once, not per forward) ------------
    # QKV-folded, feature-stacked gather table: table[bin, sec*NE + n*E + f]
    #   sec 0 (q): ((emb_n[bin] @ Wq^T) + bq) * scale      (scale folded offline)
    #   sec 1 (k):  (emb_n[bin] @ Wk^T) + bk
    #   sec 2 (v):  (emb_n[bin] @ Wv^T) + bv
    # One-hot rows sum to exactly 1 so the folded bias is selected exactly.
    Wq, Wk, Wv = in_proj_w[:E], in_proj_w[E:2 * E], in_proj_w[2 * E:]
    bq, bk, bv = in_proj_b[:E], in_proj_b[E:2 * E], in_proj_b[2 * E:]

    def section(W, b, s):
        t = jnp.einsum("nbe,fe->bnf", emb, W) + b[None, None, :]    # (bins, N, E)
        return (t * s).reshape(NUM_BINS, N * E)

    table = jnp.concatenate([section(Wq, bq, scale),
                             section(Wk, bk, 1.0),
                             section(Wv, bv, 1.0)], axis=1)         # (NUM_BINS, 3*NE)
    table = jnp.zeros((BINS_PAD, 3 * N * E), jnp.float32).at[:NUM_BINS, :].set(table)

    # block-diagonal -1e30 mask (same feature attends to same feature), tiled per head
    feat = jnp.arange(NB) // BATCH
    mask1 = jnp.where(feat[:, None] == feat[None, :],
                      jnp.float32(0.0), jnp.float32(-1e30))
    mask2 = jnp.tile(mask1, (H, 1))                                 # (H*NB, NB)

    # out_proj folded into the final linear
    wo_t = out_w.T                                                   # wo_t[f, e] = out_w[e, f]
    wl_t = lin_w.T                                                   # (N*E, OUT)
    w_comb = jnp.concatenate(
        [wo_t @ wl_t[n * E:(n + 1) * E, :] for n in range(N)], axis=0)   # (N*E, OUT)
    b_comb = (lin_w @ jnp.tile(out_b, N) + lin_b).reshape(1, OUT_DIM)

    return {
        # raw module weights (used by the reference)
        "emb": emb,
        "in_proj_w": in_proj_w, "in_proj_b": in_proj_b,
        "out_w": out_w, "out_b": out_b,
        "lin_w": lin_w, "lin_b": lin_b,
        # precomputed / folded views fed to the kernel
        "table": table, "mask2": mask2,
        "w_comb": w_comb, "b_comb": b_comb,
    }


# --------------------------------- main ----------------------------------------
if __name__ == "__main__":
    key = jax.random.PRNGKey(0)
    pkey, xkey = jax.random.split(key)
    params = init_params(pkey)

    # G independent forwards batched over the parallel grid axis.
    G = 4
    x = jax.random.uniform(xkey, (G, BATCH, IN_DIM), jnp.float32,
                           minval=-5.0, maxval=310.0)   # straddles the clamp range [-1, 300]

    out = jax.block_until_ready(act_mlp_forward(params, x))
    ref = jax.block_until_ready(
        jax.vmap(lambda xb: reference_forward(params, xb))(x))

    assert out.shape == (G, BATCH, OUT_DIM)
    assert np.all(np.isfinite(np.asarray(out)))
    # folded weights (QKV-in-table, out_proj-in-linear) change f32 accumulation order
    # slightly vs the unfused reference -> modest tolerance.
    np.testing.assert_allclose(np.asarray(out), np.asarray(ref), rtol=3e-4, atol=3e-5)
    np.testing.assert_allclose(np.asarray(out).sum(-1),
                               np.ones((G, BATCH)), rtol=1e-5, atol=1e-5)
    print("KERNEL_OK")
</pallas_src>

<mosaic_0001>
module attributes {stable_mosaic.version = 11 : i64} {
  func.func @kernel(%arg0: i32, %arg1: memref<1x8x8xf32, #tpu.memory_space<vmem>>, %arg2: memref<1280x192xf32, #tpu.memory_space<vmem>>, %arg3: memref<128x64xf32, #tpu.memory_space<vmem>>, %arg4: memref<64x4xf32, #tpu.memory_space<vmem>>, %arg5: memref<1x4xf32, #tpu.memory_space<vmem>>, %arg6: memref<1x8x4xf32, #tpu.memory_space<vmem>>, %arg7: memref<64x1280xf32, #tpu.memory_space<vmem>>) attributes {dimension_semantics = [#tpu.dimension_semantics<parallel>], iteration_bounds = array<i64: 4>, scalar_prefetch = 0 : i64, scratch_operands = 1 : i64, tpu.core_type = #tpu.core_type<tc>, window_params = [{transform_indices = @transform_0, window_bounds = array<i64: 1, 8, 8>}, {pipeline_mode = #tpu.pipeline_mode<synchronous>, transform_indices = @transform_1, window_bounds = array<i64: 1280, 192>}, {pipeline_mode = #tpu.pipeline_mode<synchronous>, transform_indices = @transform_2, window_bounds = array<i64: 128, 64>}, {pipeline_mode = #tpu.pipeline_mode<synchronous>, transform_indices = @transform_3, window_bounds = array<i64: 64, 4>}, {pipeline_mode = #tpu.pipeline_mode<synchronous>, transform_indices = @transform_4, window_bounds = array<i64: 1, 4>}, {transform_indices = @transform_5, window_bounds = array<i64: 1, 8, 4>}]} {
    %c0 = arith.constant 0 : index
    %c0_0 = arith.constant 0 : index
    %c0_1 = arith.constant 0 : index
    %0 = vector.load %arg1[%c0, %c0_0, %c0_1] : memref<1x8x8xf32, #tpu.memory_space<vmem>>, vector<1x8x8xf32>
    %1 = vector.shape_cast %0 : vector<1x8x8xf32> to vector<8x8xf32>
    %cst = arith.constant -1.000000e+00 : f32
    %cst_2 = arith.constant 3.000000e+02 : f32
    %2 = vector.broadcast %cst : f32 to vector<8x8xf32>
    %3 = arith.maximumf %2, %1 : vector<8x8xf32>
    %4 = vector.broadcast %cst_2 : f32 to vector<8x8xf32>
    %5 = arith.minimumf %4, %3 : vector<8x8xf32>
    %cst_3 = arith.constant -1.000000e+00 : f32
    %6 = vector.broadcast %cst_3 : f32 to vector<8x8xf32>
    %7 = arith.subf %5, %6 : vector<8x8xf32>
    %cst_4 = arith.constant 3.65116286 : f32
    %8 = vector.broadcast %cst_4 : f32 to vector<8x8xf32>
    %9 = arith.mulf %7, %8 : vector<8x8xf32>
    %10 = math.ceil %9 : vector<8x8xf32>
    %cst_5 = arith.constant 0.000000e+00 : f32
    %c1099_i32 = arith.constant 1099 : i32
    %11 = vector.broadcast %cst_5 : f32 to vector<8x8xf32>
    %12 = arith.maximumf %11, %10 : vector<8x8xf32>
    %13 = arith.sitofp %c1099_i32 : i32 to f32
    %14 = vector.broadcast %13 : f32 to vector<8x8xf32>
    %15 = arith.minimumf %14, %12 : vector<8x8xf32>
    %16 = arith.fptosi %15 : vector<8x8xf32> to vector<8x8xi32>
    %17 = tpu.iota {dimensions = array<i32: 1>} : vector<8x1280xi32>
    %18 = vector.extract_strided_slice %16 {offsets = [0, 0], sizes = [8, 1], strides = [1, 1]} : vector<8x8xi32> to vector<8x1xi32>
    %19 = vector.broadcast %18 : vector<8x1xi32> to vector<8x1280xi32>
    %20 = arith.cmpi eq, %17, %19 : vector<8x1280xi32>
    %21 = arith.extui %20 : vector<8x1280xi1> to vector<8x1280xi32>
    %22 = arith.sitofp %21 : vector<8x1280xi32> to vector<8x1280xf32>
    %c0_6 = arith.constant 0 : index
    %c0_7 = arith.constant 0 : index
    %23 = vector.load %arg7[%c0_6, %c0_7] : memref<64x1280xf32, #tpu.memory_space<vmem>>, vector<8x1280xf32>
    tpu.vector_store %arg7[%c0_6, %c0_7], %22 {strides = array<i32>} : memref<64x1280xf32, #tpu.memory_space<vmem>>, vector<8x1280xf32>,
    %24 = vector.extract_strided_slice %16 {offsets = [0, 1], sizes = [8, 1], strides = [1, 1]} : vector<8x8xi32> to vector<8x1xi32>
    %25 = vector.broadcast %24 : vector<8x1xi32> to vector<8x1280xi32>
    %26 = arith.cmpi eq, %17, %25 : vector<8x1280xi32>
    %27 = arith.extui %26 : vector<8x1280xi1> to vector<8x1280xi32>
    %28 = arith.sitofp %27 : vector<8x1280xi32> to vector<8x1280xf32>
    %c8 = arith.constant 8 : index
    %c0_8 = arith.constant 0 : index
    %29 = vector.load %arg7[%c8, %c0_8] : memref<64x1280xf32, #tpu.memory_space<vmem>>, vector<8x1280xf32>
    tpu.vector_store %arg7[%c8, %c0_8], %28 {strides = array<i32>} : memref<64x1280xf32, #tpu.memory_space<vmem>>, vector<8x1280xf32>,
    %30 = vector.extract_strided_slice %16 {offsets = [0, 2], sizes = [8, 1], strides = [1, 1]} : vector<8x8xi32> to vector<8x1xi32>
    %31 = vector.broadcast %30 : vector<8x1xi32> to vector<8x1280xi32>
    %32 = arith.cmpi eq, %17, %31 : vector<8x1280xi32>
    %33 = arith.extui %32 : vector<8x1280xi1> to vector<8x1280xi32>
    %34 = arith.sitofp %33 : vector<8x1280xi32> to vector<8x1280xf32>
    %c16 = arith.constant 16 : index
    %c0_9 = arith.constant 0 : index
    %35 = vector.load %arg7[%c16, %c0_9] : memref<64x1280xf32, #tpu.memory_space<vmem>>, vector<8x1280xf32>
    tpu.vector_store %arg7[%c16, %c0_9], %34 {strides = array<i32>} : memref<64x1280xf32, #tpu.memory_space<vmem>>, vector<8x1280xf32>,
    %36 = vector.extract_strided_slice %16 {offsets = [0, 3], sizes = [8, 1], strides = [1, 1]} : vector<8x8xi32> to vector<8x1xi32>
    %37 = vector.broadcast %36 : vector<8x1xi32> to vector<8x1280xi32>
    %38 = arith.cmpi eq, %17, %37 : vector<8x1280xi32>
    %39 = arith.extui %38 : vector<8x1280xi1> to vector<8x1280xi32>
    %40 = arith.sitofp %39 : vector<8x1280xi32> to vector<8x1280xf32>
    %c24 = arith.constant 24 : index
    %c0_10 = arith.constant 0 : index
    %41 = vector.load %arg7[%c24, %c0_10] : memref<64x1280xf32, #tpu.memory_space<vmem>>, vector<8x1280xf32>
    tpu.vector_store %arg7[%c24, %c0_10], %40 {strides = array<i32>} : memref<64x1280xf32, #tpu.memory_space<vmem>>, vector<8x1280xf32>,
    %42 = vector.extract_strided_slice %16 {offsets = [0, 4], sizes = [8, 1], strides = [1, 1]} : vector<8x8xi32> to vector<8x1xi32>
    %43 = vector.broadcast %42 : vector<8x1xi32> to vector<8x1280xi32>
    %44 = arith.cmpi eq, %17, %43 : vector<8x1280xi32>
    %45 = arith.extui %44 : vector<8x1280xi1> to vector<8x1280xi32>
    %46 = arith.sitofp %45 : vector<8x1280xi32> to vector<8x1280xf32>
    %c32 = arith.constant 32 : index
    %c0_11 = arith.constant 0 : index
    %47 = vector.load %arg7[%c32, %c0_11] : memref<64x1280xf32, #tpu.memory_space<vmem>>, vector<8x1280xf32>
    tpu.vector_store %arg7[%c32, %c0_11], %46 {strides = array<i32>} : memref<64x1280xf32, #tpu.memory_space<vmem>>, vector<8x1280xf32>,
    %48 = vector.extract_strided_slice %16 {offsets = [0, 5], sizes = [8, 1], strides = [1, 1]} : vector<8x8xi32> to vector<8x1xi32>
    %49 = vector.broadcast %48 : vector<8x1xi32> to vector<8x1280xi32>
    %50 = arith.cmpi eq, %17, %49 : vector<8x1280xi32>
    %51 = arith.extui %50 : vector<8x1280xi1> to vector<8x1280xi32>
    %52 = arith.sitofp %51 : vector<8x1280xi32> to vector<8x1280xf32>
    %c40 = arith.constant 40 : index
    %c0_12 = arith.constant 0 : index
    %53 = vector.load %arg7[%c40, %c0_12] : memref<64x1280xf32, #tpu.memory_space<vmem>>, vector<8x1280xf32>
    tpu.vector_store %arg7[%c40, %c0_12], %52 {strides = array<i32>} : memref<64x1280xf32, #tpu.memory_space<vmem>>, vector<8x1280xf32>,
    %54 = vector.extract_strided_slice %16 {offsets = [0, 6], sizes = [8, 1], strides = [1, 1]} : vector<8x8xi32> to vector<8x1xi32>
    %55 = vector.broadcast %54 : vector<8x1xi32> to vector<8x1280xi32>
    %56 = arith.cmpi eq, %17, %55 : vector<8x1280xi32>
    %57 = arith.extui %56 : vector<8x1280xi1> to vector<8x1280xi32>
    %58 = arith.sitofp %57 : vector<8x1280xi32> to vector<8x1280xf32>
    %c48 = arith.constant 48 : index
    %c0_13 = arith.constant 0 : index
    %59 = vector.load %arg7[%c48, %c0_13] : memref<64x1280xf32, #tpu.memory_space<vmem>>, vector<8x1280xf32>
    tpu.vector_store %arg7[%c48, %c0_13], %58 {strides = array<i32>} : memref<64x1280xf32, #tpu.memory_space<vmem>>, vector<8x1280xf32>,
    %60 = vector.extract_strided_slice %16 {offsets = [0, 7], sizes = [8, 1], strides = [1, 1]} : vector<8x8xi32> to vector<8x1xi32>
    %61 = vector.broadcast %60 : vector<8x1xi32> to vector<8x1280xi32>
    %62 = arith.cmpi eq, %17, %61 : vector<8x1280xi32>
    %63 = arith.extui %62 : vector<8x1280xi1> to vector<8x1280xi32>
    %64 = arith.sitofp %63 : vector<8x1280xi32> to vector<8x1280xf32>
    %c56 = arith.constant 56 : index
    %c0_14 = arith.constant 0 : index
    %65 = vector.load %arg7[%c56, %c0_14] : memref<64x1280xf32, #tpu.memory_space<vmem>>, vector<8x1280xf32>
    tpu.vector_store %arg7[%c56, %c0_14], %64 {strides = array<i32>} : memref<64x1280xf32, #tpu.memory_space<vmem>>, vector<8x1280xf32>,
    %c0_15 = arith.constant 0 : index
    %c0_16 = arith.constant 0 : index
    %66 = vector.load %arg7[%c0_15, %c0_16] : memref<64x1280xf32, #tpu.memory_space<vmem>>, vector<64x1280xf32>
    %c0_17 = arith.constant 0 : index
    %c0_18 = arith.constant 0 : index
    %67 = vector.load %arg2[%c0_17, %c0_18] : memref<1280x192xf32, #tpu.memory_space<vmem>>, vector<1280x192xf32>
    %cst_19 = arith.constant dense<0.000000e+00> : vector<64x192xf32>
    %68 = tpu.matmul %66, %67, %cst_19 {dimension_numbers = #tpu.dot_dimension_numbers<[1], [0], [0], [1], [0, 0, 1, 1], [], []>} : vector<64x1280xf32>, vector<1280x192xf32>, vector<64x192xf32> -> vector<64x192xf32>
    %69 = vector.extract_strided_slice %68 {offsets = [0, 0], sizes = [8, 8], strides = [1, 1]} : vector<64x192xf32> to vector<8x8xf32>
    %70 = vector.extract_strided_slice %68 {offsets = [8, 8], sizes = [8, 8], strides = [1, 1]} : vector<64x192xf32> to vector<8x8xf32>
    %71 = vector.extract_strided_slice %68 {offsets = [16, 16], sizes = [8, 8], strides = [1, 1]} : vector<64x192xf32> to vector<8x8xf32>
    %72 = vector.extract_strided_slice %68 {offsets = [24, 24], sizes = [8, 8], strides = [1, 1]} : vector<64x192xf32> to vector<8x8xf32>
    %73 = vector.extract_strided_slice %68 {offsets = [32, 32], sizes = [8, 8], strides = [1, 1]} : vector<64x192xf32> to vector<8x8xf32>
    %74 = vector.extract_strided_slice %68 {offsets = [40, 40], sizes = [8, 8], strides = [1, 1]} : vector<64x192xf32> to vector<8x8xf32>
    %75 = vector.extract_strided_slice %68 {offsets = [48, 48], sizes = [8, 8], strides = [1, 1]} : vector<64x192xf32> to vector<8x8xf32>
    %76 = vector.extract_strided_slice %68 {offsets = [56, 56], sizes = [8, 8], strides = [1, 1]} : vector<64x192xf32> to vector<8x8xf32>
    %77 = tpu.concatenate %69, %70, %71, %72, %73, %74, %75, %76 in 0 : vector<8x8xf32>, vector<8x8xf32>, vector<8x8xf32>, vector<8x8xf32>, vector<8x8xf32>, vector<8x8xf32>, vector<8x8xf32>, vector<8x8xf32> -> vector<64x8xf32>
    %78 = vector.extract_strided_slice %68 {offsets = [0, 64], sizes = [8, 8], strides = [1, 1]} : vector<64x192xf32> to vector<8x8xf32>
    %79 = vector.extract_strided_slice %68 {offsets = [8, 72], sizes = [8, 8], strides = [1, 1]} : vector<64x192xf32> to vector<8x8xf32>
    %80 = vector.extract_strided_slice %68 {offsets = [16, 80], sizes = [8, 8], strides = [1, 1]} : vector<64x192xf32> to vector<8x8xf32>
    %81 = vector.extract_strided_slice %68 {offsets = [24, 88], sizes = [8, 8], strides = [1, 1]} : vector<64x192xf32> to vector<8x8xf32>
    %82 = vector.extract_strided_slice %68 {offsets = [32, 96], sizes = [8, 8], strides = [1, 1]} : vector<64x192xf32> to vector<8x8xf32>
    %83 = vector.extract_strided_slice %68 {offsets = [40, 104], sizes = [8, 8], strides = [1, 1]} : vector<64x192xf32> to vector<8x8xf32>
    %84 = vector.extract_strided_slice %68 {offsets = [48, 112], sizes = [8, 8], strides = [1, 1]} : vector<64x192xf32> to vector<8x8xf32>
    %85 = vector.extract_strided_slice %68 {offsets = [56, 120], sizes = [8, 8], strides = [1, 1]} : vector<64x192xf32> to vector<8x8xf32>
    %86 = tpu.concatenate %78, %79, %80, %81, %82, %83, %84, %85 in 0 : vector<8x8xf32>, vector<8x8xf32>, vector<8x8xf32>, vector<8x8xf32>, vector<8x8xf32>, vector<8x8xf32>, vector<8x8xf32>, vector<8x8xf32> -> vector<64x8xf32>
    %87 = vector.extract_strided_slice %68 {offsets = [0, 128], sizes = [8, 8], strides = [1, 1]} : vector<64x192xf32> to vector<8x8xf32>
    %88 = vector.extract_strided_slice %68 {offsets = [8, 136], sizes = [8, 8], strides = [1, 1]} : vector<64x192xf32> to vector<8x8xf32>
    %89 = vector.extract_strided_slice %68 {offsets = [16, 144], sizes = [8, 8], strides = [1, 1]} : vector<64x192xf32> to vector<8x8xf32>
    %90 = vector.extract_strided_slice %68 {offsets = [24, 152], sizes = [8, 8], strides = [1, 1]} : vector<64x192xf32> to vector<8x8xf32>
    %91 = vector.extract_strided_slice %68 {offsets = [32, 160], sizes = [8, 8], strides = [1, 1]} : vector<64x192xf32> to vector<8x8xf32>
    %92 = vector.extract_strided_slice %68 {offsets = [40, 168], sizes = [8, 8], strides = [1, 1]} : vector<64x192xf32> to vector<8x8xf32>
    %93 = vector.extract_strided_slice %68 {offsets = [48, 176], sizes = [8, 8], strides = [1, 1]} : vector<64x192xf32> to vector<8x8xf32>
    %94 = vector.extract_strided_slice %68 {offsets = [56, 184], sizes = [8, 8], strides = [1, 1]} : vector<64x192xf32> to vector<8x8xf32>
    %95 = tpu.concatenate %87, %88, %89, %90, %91, %92, %93, %94 in 0 : vector<8x8xf32>, vector<8x8xf32>, vector<8x8xf32>, vector<8x8xf32>, vector<8x8xf32>, vector<8x8xf32>, vector<8x8xf32>, vector<8x8xf32> -> vector<64x8xf32>
    %cst_20 = arith.constant 0.000000e+00 : f32
    %96 = vector.broadcast %cst_20 : f32 to vector<64x4xf32>
    %97 = vector.extract_strided_slice %77 {offsets = [0, 0], sizes = [64, 4], strides = [1, 1]} : vector<64x8xf32> to vector<64x4xf32>
    %98 = tpu.concatenate %97, %96 in 1 : vector<64x4xf32>, vector<64x4xf32> -> vector<64x8xf32>
    %99 = vector.extract_strided_slice %77 {offsets = [0, 4], sizes = [64, 4], strides = [1, 1]} : vector<64x8xf32> to vector<64x4xf32>
    %100 = tpu.concatenate %96, %99 in 1 : vector<64x4xf32>, vector<64x4xf32> -> vector<64x8xf32>
    %101 = tpu.concatenate %98, %100 in 0 : vector<64x8xf32>, vector<64x8xf32> -> vector<128x8xf32>
    %cst_21 = arith.constant dense<0.000000e+00> : vector<128x64xf32>
    %102 = tpu.matmul %101, %86, %cst_21 {dimension_numbers = #tpu.dot_dimension_numbers<[1], [1], [0], [0], [0, 0, 1, 0], [], []>} : vector<128x8xf32>, vector<64x8xf32>, vector<128x64xf32> -> vector<128x64xf32>
    %c0_22 = arith.constant 0 : index
    %c0_23 = arith.constant 0 : index
    %103 = vector.load %arg3[%c0_22, %c0_23] : memref<128x64xf32, #tpu.memory_space<vmem>>, vector<128x64xf32>
    %104 = arith.addf %102, %103 : vector<128x64xf32>
    %cst_24 = arith.constant dense<0xFF800000> : vector<128xf32>
    %105 = vector.multi_reduction <maximumf>, %104, %cst_24 [1] : vector<128x64xf32> to vector<128xf32>
    %106 = vector.shape_cast %105 : vector<128xf32> to vector<128x1xf32>
    %107 = vector.broadcast %106 : vector<128x1xf32> to vector<128x64xf32>
    %108 = arith.subf %104, %107 : vector<128x64xf32>
    %109 = math.exp %108 : vector<128x64xf32>
    %cst_25 = arith.constant dense<0.000000e+00> : vector<128xf32>
    %110 = vector.multi_reduction <add>, %109, %cst_25 [1] : vector<128x64xf32> to vector<128xf32>
    %111 = vector.shape_cast %110 : vector<128xf32> to vector<128x1xf32>
    %112 = tpu.reciprocal %111 : vector<128x1xf32> -> vector<128x1xf32>
    %113 = vector.broadcast %112 : vector<128x1xf32> to vector<128x64xf32>
    %114 = arith.mulf %109, %113 : vector<128x64xf32>
    %cst_26 = arith.constant dense<0.000000e+00> : vector<128x8xf32>
    %115 = tpu.matmul %114, %95, %cst_26 {dimension_numbers = #tpu.dot_dimension_numbers<[1], [0], [0], [1], [0, 0, 1, 1], [], []>} : vector<128x64xf32>, vector<64x8xf32>, vector<128x8xf32> -> vector<128x8xf32>
    %116 = vector.extract_strided_slice %115 {offsets = [0, 0], sizes = [64, 4], strides = [1, 1]} : vector<128x8xf32> to vector<64x4xf32>
    %117 = vector.extract_strided_slice %115 {offsets = [64, 4], sizes = [64, 4], strides = [1, 1]} : vector<128x8xf32> to vector<64x4xf32>
    %118 = tpu.concatenate %116, %117 in 1 : vector<64x4xf32>, vector<64x4xf32> -> vector<64x8xf32>
    %cst_27 = arith.constant 0.000000e+00 : f32
    %119 = vector.broadcast %cst_27 : f32 to vector<8x4xf32>
    %120 = vector.extract_strided_slice %118 {offsets = [0, 0], sizes = [8, 8], strides = [1, 1]} : vector<64x8xf32> to vector<8x8xf32>
    %c0_28 = arith.constant 0 : index
    %c0_29 = arith.constant 0 : index
    %121 = vector.load %arg4[%c0_28, %c0_29] : memref<64x4xf32, #tpu.memory_space<vmem>>, vector<8x4xf32>
    %cst_30 = arith.constant dense<0.000000e+00> : vector<8x4xf32>
    %122 = tpu.matmul %120, %121, %cst_30 {dimension_numbers = #tpu.dot_dimension_numbers<[1], [0], [0], [1], [0, 0, 1, 1], [], []>} : vector<8x8xf32>, vector<8x4xf32>, vector<8x4xf32> -> vector<8x4xf32>
    %123 = arith.addf %119, %122 : vector<8x4xf32>
    %124 = vector.extract_strided_slice %118 {offsets = [8, 0], sizes = [8, 8], strides = [1, 1]} : vector<64x8xf32> to vector<8x8xf32>
    %c8_31 = arith.constant 8 : index
    %c0_32 = arith.constant 0 : index
    %125 = vector.load %arg4[%c8_31, %c0_32] : memref<64x4xf32, #tpu.memory_space<vmem>>, vector<8x4xf32>
    %cst_33 = arith.constant dense<0.000000e+00> : vector<8x4xf32>
    %126 = tpu.matmul %124, %125, %cst_33 {dimension_numbers = #tpu.dot_dimension_numbers<[1], [0], [0], [1], [0, 0, 1, 1], [], []>} : vector<8x8xf32>, vector<8x4xf32>, vector<8x4xf32> -> vector<8x4xf32>
    %127 = arith.addf %123, %126 : vector<8x4xf32>
    %128 = vector.extract_strided_slice %118 {offsets = [16, 0], sizes = [8, 8], strides = [1, 1]} : vector<64x8xf32> to vector<8x8xf32>
    %c16_34 = arith.constant 16 : index
    %c0_35 = arith.constant 0 : index
    %129 = vector.load %arg4[%c16_34, %c0_35] : memref<64x4xf32, #tpu.memory_space<vmem>>, vector<8x4xf32>
    %cst_36 = arith.constant dense<0.000000e+00> : vector<8x4xf32>
    %130 = tpu.matmul %128, %129, %cst_36 {dimension_numbers = #tpu.dot_dimension_numbers<[1], [0], [0], [1], [0, 0, 1, 1], [], []>} : vector<8x8xf32>, vector<8x4xf32>, vector<8x4xf32> -> vector<8x4xf32>
    %131 = arith.addf %127, %130 : vector<8x4xf32>
    %132 = vector.extract_strided_slice %118 {offsets = [24, 0], sizes = [8, 8], strides = [1, 1]} : vector<64x8xf32> to vector<8x8xf32>
    %c24_37 = arith.constant 24 : index
    %c0_38 = arith.constant 0 : index
    %133 = vector.load %arg4[%c24_37, %c0_38] : memref<64x4xf32, #tpu.memory_space<vmem>>, vector<8x4xf32>
    %cst_39 = arith.constant dense<0.000000e+00> : vector<8x4xf32>
    %134 = tpu.matmul %132, %133, %cst_39 {dimension_numbers = #tpu.dot_dimension_numbers<[1], [0], [0], [1], [0, 0, 1, 1], [], []>} : vector<8x8xf32>, vector<8x4xf32>, vector<8x4xf32> -> vector<8x4xf32>
    %135 = arith.addf %131, %134 : vector<8x4xf32>
    %136 = vector.extract_strided_slice %118 {offsets = [32, 0], sizes = [8, 8], strides = [1, 1]} : vector<64x8xf32> to vector<8x8xf32>
    %c32_40 = arith.constant 32 : index
    %c0_41 = arith.constant 0 : index
    %137 = vector.load %arg4[%c32_40, %c0_41] : memref<64x4xf32, #tpu.memory_space<vmem>>, vector<8x4xf32>
    %cst_42 = arith.constant dense<0.000000e+00> : vector<8x4xf32>
    %138 = tpu.matmul %136, %137, %cst_42 {dimension_numbers = #tpu.dot_dimension_numbers<[1], [0], [0], [1], [0, 0, 1, 1], [], []>} : vector<8x8xf32>, vector<8x4xf32>, vector<8x4xf32> -> vector<8x4xf32>
    %139 = arith.addf %135, %138 : vector<8x4xf32>
    %140 = vector.extract_strided_slice %118 {offsets = [40, 0], sizes = [8, 8], strides = [1, 1]} : vector<64x8xf32> to vector<8x8xf32>
    %c40_43 = arith.constant 40 : index
    %c0_44 = arith.constant 0 : index
    %141 = vector.load %arg4[%c40_43, %c0_44] : memref<64x4xf32, #tpu.memory_space<vmem>>, vector<8x4xf32>
    %cst_45 = arith.constant dense<0.000000e+00> : vector<8x4xf32>
    %142 = tpu.matmul %140, %141, %cst_45 {dimension_numbers = #tpu.dot_dimension_numbers<[1], [0], [0], [1], [0, 0, 1, 1], [], []>} : vector<8x8xf32>, vector<8x4xf32>, vector<8x4xf32> -> vector<8x4xf32>
    %143 = arith.addf %139, %142 : vector<8x4xf32>
    %144 = vector.extract_strided_slice %118 {offsets = [48, 0], sizes = [8, 8], strides = [1, 1]} : vector<64x8xf32> to vector<8x8xf32>
    %c48_46 = arith.constant 48 : index
    %c0_47 = arith.constant 0 : index
    %145 = vector.load %arg4[%c48_46, %c0_47] : memref<64x4xf32, #tpu.memory_space<vmem>>, vector<8x4xf32>
    %cst_48 = arith.constant dense<0.000000e+00> : vector<8x4xf32>
    %146 = tpu.matmul %144, %145, %cst_48 {dimension_numbers = #tpu.dot_dimension_numbers<[1], [0], [0], [1], [0, 0, 1, 1], [], []>} : vector<8x8xf32>, vector<8x4xf32>, vector<8x4xf32> -> vector<8x4xf32>
    %147 = arith.addf %143, %146 : vector<8x4xf32>
    %148 = vector.extract_strided_slice %118 {offsets = [56, 0], sizes = [8, 8], strides = [1, 1]} : vector<64x8xf32> to vector<8x8xf32>
    %c56_49 = arith.constant 56 : index
    %c0_50 = arith.constant 0 : index
    %149 = vector.load %arg4[%c56_49, %c0_50] : memref<64x4xf32, #tpu.memory_space<vmem>>, vector<8x4xf32>
    %cst_51 = arith.constant dense<0.000000e+00> : vector<8x4xf32>
    %150 = tpu.matmul %148, %149, %cst_51 {dimension_numbers = #tpu.dot_dimension_numbers<[1], [0], [0], [1], [0, 0, 1, 1], [], []>} : vector<8x8xf32>, vector<8x4xf32>, vector<8x4xf32> -> vector<8x4xf32>
    %151 = arith.addf %147, %150 : vector<8x4xf32>
    %c0_52 = arith.constant 0 : index
    %c0_53 = arith.constant 0 : index
    %152 = vector.load %arg5[%c0_52, %c0_53] : memref<1x4xf32, #tpu.memory_space<vmem>>, vector<1x4xf32>
    %153 = vector.broadcast %152 : vector<1x4xf32> to vector<8x4xf32>
    %154 = arith.addf %151, %153 : vector<8x4xf32>
    %cst_54 = arith.constant dense<0xFF800000> : vector<8xf32>
    %155 = vector.multi_reduction <maximumf>, %154, %cst_54 [1] : vector<8x4xf32> to vector<8xf32>
    %156 = vector.shape_cast %155 : vector<8xf32> to vector<8x1xf32>
    %157 = vector.broadcast %156 : vector<8x1xf32> to vector<8x4xf32>
    %158 = arith.subf %154, %157 : vector<8x4xf32>
    %159 = math.exp %158 : vector<8x4xf32>
    %cst_55 = arith.constant dense<0.000000e+00> : vector<8xf32>
    %160 = vector.multi_reduction <add>, %159, %cst_55 [1] : vector<8x4xf32> to vector<8xf32>
    %161 = vector.shape_cast %160 : vector<8xf32> to vector<8x1xf32>
    %162 = tpu.reciprocal %161 : vector<8x1xf32> -> vector<8x1xf32>
    %163 = vector.broadcast %162 : vector<8x1xf32> to vector<8x4xf32>
    %164 = arith.mulf %159, %163 : vector<8x4xf32>
    %c0_56 = arith.constant 0 : index
    %c0_57 = arith.constant 0 : index
    %c0_58 = arith.constant 0 : index
    %165 = vector.load %arg6[%c0_56, %c0_57, %c0_58] : memref<1x8x4xf32, #tpu.memory_space<vmem>>, vector<1x8x4xf32>
    %166 = vector.shape_cast %165 : vector<1x8x4xf32> to vector<8x4xf32>
    %167 = vector.shape_cast %164 : vector<8x4xf32> to vector<1x8x4xf32>
    tpu.vector_store %arg6[%c0_56, %c0_57, %c0_58], %167 {strides = array<i32>} : memref<1x8x4xf32, #tpu.memory_space<vmem>>, vector<1x8x4xf32>,
    return
  }
  func.func @transform_0(%arg0: i32) -> (i32, i32, i32) {
    %c0_i32 = arith.constant 0 : i32
    %c0_i32_0 = arith.constant 0 : i32
    %c0_i32_1 = arith.constant 0 : i32
    return %arg0, %c0_i32, %c0_i32_0 : i32, i32, i32
  }
  func.func @transform_1(%arg0: i32) -> (i32, i32) {
    %c0_i32 = arith.constant 0 : i32
    %c0_i32_0 = arith.constant 0 : i32
    %c0_i32_1 = arith.constant 0 : i32
    return %c0_i32, %c0_i32_0 : i32, i32
  }
  func.func @transform_2(%arg0: i32) -> (i32, i32) {
    %c0_i32 = arith.constant 0 : i32
    %c0_i32_0 = arith.constant 0 : i32
    %c0_i32_1 = arith.constant 0 : i32
    return %c0_i32, %c0_i32_0 : i32, i32
  }
  func.func @transform_3(%arg0: i32) -> (i32, i32) {
    %c0_i32 = arith.constant 0 : i32
    %c0_i32_0 = arith.constant 0 : i32
    %c0_i32_1 = arith.constant 0 : i32
    return %c0_i32, %c0_i32_0 : i32, i32
  }
  func.func @transform_4(%arg0: i32) -> (i32, i32) {
    %c0_i32 = arith.constant 0 : i32
    %c0_i32_0 = arith.constant 0 : i32
    %c0_i32_1 = arith.constant 0 : i32
    return %c0_i32, %c0_i32_0 : i32, i32
  }
  func.func @transform_5(%arg0: i32) -> (i32, i32, i32) {
    %c0_i32 = arith.constant 0 : i32
    %c0_i32_0 = arith.constant 0 : i32
    %c0_i32_1 = arith.constant 0 : i32
    return %arg0, %c0_i32, %c0_i32_0 : i32, i32, i32
  }
}

</mosaic_0001>

<bundles_post_ra>
// kernel: act_mlp_forward.1
= control target key start
LH: loop header
LB: loop body
LE: loop exit
PB: predicated region body
PF: predicated region fallthrough
CT: control target
= control target key end

     0   :  { %s3932_s18 = smov 0   ;;  %s5694_s0 = inlined_call_operand.vmem [shape: f32[4,8,8], index: 0, kind: input, shape index: {}]   ;;  %s5695_s1 = inlined_call_operand.vmem [shape: f32[1280,192], index: 1, kind: input, shape index: {}]   ;;  %s5696_s2 = inlined_call_operand.vmem [shape: f32[128,64], index: 2, kind: input, shape index: {}]   ;;  %s5697_s3 = inlined_call_operand.vmem [shape: f32[64,4], index: 3, kind: input, shape index: {}]   ;;  %s5698_s4 = inlined_call_operand.vmem [shape: f32[1,4], index: 4, kind: input, shape index: {}]   ;;  %s5699_s5 = inlined_call_operand.vmem [shape: f32[4,8,4], index: 5, kind: output, shape index: {}]  }
   0x1 LB: > { %s2914_s19 = sadd.s32 4294967295, %s3881_s18   ;;  %p2918_p0 = scmp.ge.s32.totalorder %s3881_s18, 1  ;;  %s3881_s18 = sphi %s3932_s18, %s15_s18  }
   0x2   : > { %p186_p1 = scmp.lt.s32.totalorder %s3881_s18, 5 }
   0x4   : > { %p187_p2 = pnand %p2918_p0, %p186_p1 }
   0x5   : > { %p212_p3 = scmp.lt.s32.totalorder (!%p187_p2), %s2914_s19, 3  ;;  %v665_v0 = vld [vmem:[%s5695_s1 + $0x8] sm:$0xff] (!%p187_p2)  ;;  %v3883_v1 = vmov (!%p187_p2), 0   ;;  %v3884_v2 = vmov (!%p187_p2), 2   ;;  %v667_v3 = vld [vmem:[%s5695_s1 + $0x18] sm:$0xff] (!%p187_p2)  ;;  %v664_v7 = vld [vmem:[%s5695_s1] sm:$0xff] (!%p187_p2) }
   0x6   : > { %190 = sbr.rel (%p187_p2) target bundleno = 2154 (0x86a), region = 40  ;;  %3778 = vset.pattern.permute.xlu0 (!%p187_p2), %v3883_v1  ;;  %3780 = vset.pattern.permute.xlu1 (!%p187_p2), %v3884_v2  ;;  %v793_v4 = vld [vmem:[%s5695_s1 + $0x408] sm:$0xff] (!%p187_p2)  ;;  %v3317_v5 = vpack.c.bf16 (!%p187_p2), %v667_v3, %v665_v0  ;;  %v795_v6 = vld [vmem:[%s5695_s1 + $0x418] sm:$0xff] (!%p187_p2)  ;;  %v666_v8 = vld [vmem:[%s5695_s1 + $0x10] sm:$0xff] (!%p187_p2)  ;;  %s3892_s25 = smov (!%p187_p2), 120  }
   0x7   : > { %v3445_v9 = vpack.c.bf16 (!%p187_p2), %v795_v6, %v793_v4  ;;  %v3319_v10 = vpack.c.bf16 (!%p187_p2), %v666_v8, %v664_v7  ;;  %v792_v11 = vld [vmem:[%s5695_s1 + $0x400] sm:$0xff] (!%p187_p2)  ;;  %v794_v12 = vld [vmem:[%s5695_s1 + $0x410] sm:$0xff] (!%p187_p2)  ;;  %v669_v13 = vld [vmem:[%s5695_s1 + $0x28] sm:$0xff] (!%p187_p2)  ;;  %s3893_s26 = smov (!%p187_p2), 112   ;;  %s3894_s27 = smov (!%p187_p2), 104  }
   0x8   : > { %3318 = vmatprep.subr.bf16.mxu1 (!%p187_p2), %v3317_v5  ;;  %v3447_v14 = vpack.c.bf16 (!%p187_p2), %v794_v12, %v792_v11  ;;  %v671_v15 = vld [vmem:[%s5695_s1 + $0x38] sm:$0xff] (!%p187_p2)  ;;  %v797_v16 = vld [vmem:[%s5695_s1 + $0x428] sm:$0xff] (!%p187_p2)  ;;  %v668_v20 = vld [vmem:[%s5695_s1 + $0x20] sm:$0xff] (!%p187_p2)  ;;  %s3895_s28 = smov (!%p187_p2), 96   ;;  %s3896_s29 = smov (!%p187_p2), 88  }
   0x9   : > { %v799_v17 = vld [vmem:[%s5695_s1 + $0x438] sm:$0xff] (!%p187_p2)  ;;  %3446 = vmatprep.subr.bf16.mxu0 (!%p187_p2), %v3445_v9  ;;  %3320 = vmatpush1.bf16.msra.mxu1 (!%p187_p2), %v3319_v10  ;;  %v3321_v18 = vpack.c.bf16 (!%p187_p2), %v671_v15, %v669_v13  ;;  %v670_v21 = vld [vmem:[%s5695_s1 + $0x30] sm:$0xff] (!%p187_p2)  ;;  %v796_v22 = vld [vmem:[%s5695_s1 + $0x420] sm:$0xff] (!%p187_p2)  ;;  %s3897_s30 = smov (!%p187_p2), 80   ;;  %s3898_s6 = smov (!%p187_p2), 72  }
   0xa   : > { %v3449_v19 = vpack.c.bf16 (!%p187_p2), %v799_v17, %v797_v16  ;;  %3448 = vmatpush1.bf16.msra.mxu0 (!%p187_p2), %v3447_v14  ;;  %v3323_v24 = vpack.c.bf16 (!%p187_p2), %v670_v21, %v668_v20  ;;  %v798_v25 = vld [vmem:[%s5695_s1 + $0x430] sm:$0xff] (!%p187_p2)  ;;  %v673_v26 = vld [vmem:[%s5695_s1 + $0x48] sm:$0xff] (!%p187_p2)  ;;  %v675_v29 = vld [vmem:[%s5695_s1 + $0x58] sm:$0xff] (!%p187_p2)  ;;  %s3899_s7 = smov (!%p187_p2), 64  }
   0xb   : > { %3322 = vmatprep.subr.bf16.mxu1 (!%p187_p2), %v3321_v18  ;;  %v3451_v28 = vpack.c.bf16 (!%p187_p2), %v798_v25, %v796_v22  ;;  %v801_v30 = vld [vmem:[%s5695_s1 + $0x448] sm:$0xff] (!%p187_p2)  ;;  %v803_v31 = vld [vmem:[%s5695_s1 + $0x458] sm:$0xff] (!%p187_p2)  ;;  %v3325_v32 = vpack.c.bf16 (!%p187_p2), %v675_v29, %v673_v26  ;;  %v672_v34 = vld [vmem:[%s5695_s1 + $0x40] sm:$0xff] (!%p187_p2) }
   0xc   : > { %3450 = vmatprep.subr.bf16.mxu0 (!%p187_p2), %v3449_v19  ;;  %v3453_v33 = vpack.c.bf16 (!%p187_p2), %v803_v31, %v801_v30  ;;  %v674_v35 = vld [vmem:[%s5695_s1 + $0x50] sm:$0xff] (!%p187_p2)  ;;  %v800_v36 = vld [vmem:[%s5695_s1 + $0x440] sm:$0xff] (!%p187_p2)  ;;  %v677_v40 = vld [vmem:[%s5695_s1 + $0x68] sm:$0xff] (!%p187_p2) }
   0xd   : > { %s5703_s19 = smov (!%p212_p3, %s2914_s19), 3  ;;  %3324 = vmatpush1.bf16.msra.mxu1 %v3323_v24  ;;  %v3327_v38 = vpack.c.bf16 %v674_v35, %v672_v34  ;;  %v802_v39 = vld [vmem:[%s5695_s1 + $0x450] sm:$0xff]  ;;  %v679_v41 = vld [vmem:[%s5695_s1 + $0x78] sm:$0xff]  ;;  %v805_v44 = vld [vmem:[%s5695_s1 + $0x468] sm:$0xff] }
   0xe   : > { %s2919_s13 = sshll.u32 %s5703_s19, 3  ;;  %3452 = vmatpush1.bf16.msra.mxu0 %v3451_v28  ;;  %3326 = vmatprep.subr.bf16.mxu1 %v3325_v32  ;;  %v3455_v42 = vpack.c.bf16 %v802_v39, %v800_v36  ;;  %v3329_v43 = vpack.c.bf16 %v679_v41, %v677_v40  ;;  %v807_v45 = vld [vmem:[%s5695_s1 + $0x478] sm:$0xff]  ;;  %v676_v46 = vld [vmem:[%s5695_s1 + $0x60] sm:$0xff]  ;;  %v678_v49 = vld [vmem:[%s5695_s1 + $0x70] sm:$0xff]  ;;  %v3885_v40 = vmov 1   ;;  %v3886_v41 = vmov 3  }
   0xf   : > { %s215_s24 = scalar_lea.vmem %s5694_s0, %s2919_s13  ;;  %3454 = vmatprep.subr.bf16.mxu0 %v3453_v33  ;;  %v3457_v48 = vpack.c.bf16 %v807_v45, %v805_v44  ;;  %v804_v50 = vld [vmem:[%s5695_s1 + $0x460] sm:$0xff]  ;;  %v806_v51 = vld [vmem:[%s5695_s1 + $0x470] sm:$0xff]  ;;  %v681_v52 = vld [vmem:[%s5695_s1 + $0x88] sm:$0xff]  ;;  %v3331_v56 = vpack.c.bf16 %v678_v49, %v676_v46  ;;  %s219_s23 = scalar_lea.vmem %s5699_s5, %s2919_s13 }
  0x10   : > { %v220_v23 = vld [vmem:[%s215_s24] sm:$0xff]  ;;  %v683_v53 = vld [vmem:[%s5695_s1 + $0x98] sm:$0xff]  ;;  %v809_v54 = vld [vmem:[%s5695_s1 + $0x488] sm:$0xff]  ;;  %v3459_v58 = vpack.c.bf16 %v806_v51, %v804_v50 }
  0x11   : > { %v221_v27 = vmax.f32 %v220_v23, -1.0  ;;  %3328 = vmatpush1.bf16.msra.mxu1 %v3327_v38  ;;  %v811_v57 = vld [vmem:[%s5695_s1 + $0x498] sm:$0xff]  ;;  %v3333_v59 = vpack.c.bf16 %v683_v53, %v681_v52  ;;  %v680_v60 = vld [vmem:[%s5695_s1 + $0x80] sm:$0xff]  ;;  %v682_v61 = vld [vmem:[%s5695_s1 + $0x90] sm:$0xff] }
  0x12   : > { %3456 = vmatpush1.bf16.msra.mxu0 %v3455_v42  ;;  %3330 = vmatprep.subr.bf16.mxu1 %v3329_v43  ;;  %v808_v62 = vld [vmem:[%s5695_s1 + $0x480] sm:$0xff]  ;;  %v3461_v0 = vpack.c.bf16 %v811_v57, %v809_v54  ;;  %v810_v1 = vld [vmem:[%s5695_s1 + $0x490] sm:$0xff]  ;;  %v685_v2 = vld [vmem:[%s5695_s1 + $0xa8] sm:$0xff]  ;;  %v3335_v7 = vpack.c.bf16 %v682_v61, %v680_v60 }
  0x13   : > { %v222_v37 = vmin.f32 %v221_v27, 300.0  ;;  %3458 = vmatprep.subr.bf16.mxu0 %v3457_v48  ;;  %v687_v3 = vld [vmem:[%s5695_s1 + $0xb8] sm:$0xff]  ;;  %v813_v4 = vld [vmem:[%s5695_s1 + $0x4a8] sm:$0xff]  ;;  %v3463_v8 = vpack.c.bf16 %v810_v1, %v808_v62  ;;  %v684_v10 = vld [vmem:[%s5695_s1 + $0xa0] sm:$0xff] }
  0x14   : > { %v815_v5 = vld [vmem:[%s5695_s1 + $0x4b8] sm:$0xff]  ;;  %v3337_v9 = vpack.c.bf16 %v687_v3, %v685_v2  ;;  %v686_v11 = vld [vmem:[%s5695_s1 + $0xb0] sm:$0xff]  ;;  %v812_v14 = vld [vmem:[%s5695_s1 + $0x4a0] sm:$0xff] }
  0x15   : > { %v2921_v47 = vadd.f32 1.0, %v222_v37  ;;  %3332 = vmatpush1.bf16.msra.mxu1 %v3331_v56  ;;  %v3465_v13 = vpack.c.bf16 %v815_v5, %v813_v4  ;;  %v814_v15 = vld [vmem:[%s5695_s1 + $0x4b0] sm:$0xff]  ;;  %v689_v16 = vld [vmem:[%s5695_s1 + $0xc8] sm:$0xff]  ;;  %v691_v17 = vld [vmem:[%s5695_s1 + $0xd8] sm:$0xff]  ;;  %v3339_v21 = vpack.c.bf16 %v686_v11, %v684_v10  ;;  %v3888_v56 = vmov 5  }
  0x16   : > { %3460 = vmatpush1.bf16.msra.mxu0 %v3459_v58  ;;  %3334 = vmatprep.subr.bf16.mxu1 %v3333_v59  ;;  %v817_v18 = vld [vmem:[%s5695_s1 + $0x4c8] sm:$0xff]  ;;  %v819_v19 = vld [vmem:[%s5695_s1 + $0x4d8] sm:$0xff]  ;;  %v3467_v22 = vpack.c.bf16 %v814_v15, %v812_v14  ;;  %v3341_v24 = vpack.c.bf16 %v691_v17, %v689_v16  ;;  %v688_v26 = vld [vmem:[%s5695_s1 + $0xc0] sm:$0xff]  ;;  %v3890_v11 = vmov 7  }
  0x17   : > { %v224_v55 = vmul.f32 3.6511629, %v2921_v47  ;;  %3462 = vmatprep.subr.bf16.mxu0 %v3461_v0  ;;  %v3469_v25 = vpack.c.bf16 %v819_v19, %v817_v18  ;;  %v690_v27 = vld [vmem:[%s5695_s1 + $0xd0] sm:$0xff]  ;;  %v816_v28 = vld [vmem:[%s5695_s1 + $0x4c0] sm:$0xff]  ;;  %v693_v30 = vld [vmem:[%s5695_s1 + $0xe8] sm:$0xff] }
  0x18   : > { %v818_v29 = vld [vmem:[%s5695_s1 + $0x4d0] sm:$0xff]  ;;  %v695_v31 = vld [vmem:[%s5695_s1 + $0xf8] sm:$0xff]  ;;  %v821_v32 = vld [vmem:[%s5695_s1 + $0x4e8] sm:$0xff]  ;;  %v3343_v34 = vpack.c.bf16 %v690_v27, %v688_v26 }
  0x19   : > { %v225_v63 = vceil.f32 %v224_v55  ;;  %3336 = vmatpush1.bf16.msra.mxu1 %v3335_v7  ;;  %v823_v33 = vld [vmem:[%s5695_s1 + $0x4f8] sm:$0xff]  ;;  %v3471_v35 = vpack.c.bf16 %v818_v29, %v816_v28  ;;  %v3345_v36 = vpack.c.bf16 %v695_v31, %v693_v30  ;;  %v692_v38 = vld [vmem:[%s5695_s1 + $0xe0] sm:$0xff]  ;;  %v694_v39 = vld [vmem:[%s5695_s1 + $0xf0] sm:$0xff]  ;;  %v3887_v55 = vmov 4  }
  0x1a   : > { %3464 = vmatpush1.bf16.msra.mxu0 %v3463_v8  ;;  %3338 = vmatprep.subr.bf16.mxu1 %v3337_v9  ;;  %v3473_v37 = vpack.c.bf16 %v823_v33, %v821_v32  ;;  %v820_v42 = vld [vmem:[%s5695_s1 + $0x4e0] sm:$0xff]  ;;  %v822_v43 = vld [vmem:[%s5695_s1 + $0x4f0] sm:$0xff]  ;;  %v697_v44 = vld [vmem:[%s5695_s1 + $0x108] sm:$0xff]  ;;  %v3347_v48 = vpack.c.bf16 %v694_v39, %v692_v38  ;;  %v3889_v7 = vmov 6  }
  0x1b   : > { %v226_v6 = vmax.f32 %v225_v63, 0.0  ;;  %3466 = vmatprep.subr.bf16.mxu0 %v3465_v13  ;;  %v699_v45 = vld [vmem:[%s5695_s1 + $0x118] sm:$0xff]  ;;  %v825_v46 = vld [vmem:[%s5695_s1 + $0x508] sm:$0xff]  ;;  %v3475_v49 = vpack.c.bf16 %v822_v43, %v820_v42  ;;  %v696_v52 = vld [vmem:[%s5695_s1 + $0x100] sm:$0xff] }
  0x1c   : > { %v827_v47 = vld [vmem:[%s5695_s1 + $0x518] sm:$0xff]  ;;  %v3349_v50 = vpack.c.bf16 %v699_v45, %v697_v44  ;;  %v698_v53 = vld [vmem:[%s5695_s1 + $0x110] sm:$0xff]  ;;  %v824_v54 = vld [vmem:[%s5695_s1 + $0x500] sm:$0xff] }
  0x1d   : > { %v227_v12 = vmin.f32 %v226_v6, 1099.0  ;;  %3340 = vmatpush1.bf16.msra.mxu1 %v3339_v21  ;;  %v3477_v51 = vpack.c.bf16 %v827_v47, %v825_v46  ;;  %v826_v57 = vld [vmem:[%s5695_s1 + $0x510] sm:$0xff]  ;;  %v701_v58 = vld [vmem:[%s5695_s1 + $0x128] sm:$0xff]  ;;  %v703_v59 = vld [vmem:[%s5695_s1 + $0x138] sm:$0xff]  ;;  %v3351_v62 = vpack.c.bf16 %v698_v53, %v696_v52 }
  0x1e   : > { %3468 = vmatpush1.bf16.msra.mxu0 %v3467_v22  ;;  %3342 = vmatprep.subr.bf16.mxu1 %v3341_v24  ;;  %v829_v60 = vld [vmem:[%s5695_s1 + $0x528] sm:$0xff]  ;;  %v831_v61 = vld [vmem:[%s5695_s1 + $0x538] sm:$0xff]  ;;  %v3479_v63 = vpack.c.bf16 %v826_v57, %v824_v54  ;;  %v3353_v0 = vpack.c.bf16 %v703_v59, %v701_v58  ;;  %v700_v1 = vld [vmem:[%s5695_s1 + $0x120] sm:$0xff] }
  0x1f   : > { %v3749_v20 = vtrunc.f32 %v227_v12  ;;  %3470 = vmatprep.subr.bf16.mxu0 %v3469_v25  ;;  %v702_v2 = vld [vmem:[%s5695_s1 + $0x130] sm:$0xff]  ;;  %v3481_v3 = vpack.c.bf16 %v831_v61, %v829_v60  ;;  %v828_v4 = vld [vmem:[%s5695_s1 + $0x520] sm:$0xff]  ;;  %v705_v6 = vld [vmem:[%s5695_s1 + $0x148] sm:$0xff] }
  0x20   : > { %v830_v5 = vld [vmem:[%s5695_s1 + $0x530] sm:$0xff]  ;;  %v707_v8 = vld [vmem:[%s5695_s1 + $0x158] sm:$0xff]  ;;  %v833_v9 = vld [vmem:[%s5695_s1 + $0x548] sm:$0xff]  ;;  %v3355_v12 = vpack.c.bf16 %v702_v2, %v700_v1 }
  0x21   : > { %v4104_v23 = vcvt.f32.s32 %v3749_v20  ;;  %3344 = vmatpush1.bf16.msra.mxu1 %v3343_v34  ;;  %v835_v10 = vld [vmem:[%s5695_s1 + $0x558] sm:$0xff]  ;;  %v3483_v13 = vpack.c.bf16 %v830_v5, %v828_v4  ;;  %v704_v14 = vld [vmem:[%s5695_s1 + $0x140] sm:$0xff]  ;;  %v706_v15 = vld [vmem:[%s5695_s1 + $0x150] sm:$0xff]  ;;  %v3357_v17 = vpack.c.bf16 %v707_v8, %v705_v6 }
  0x22   : > { %3472 = vmatpush1.bf16.msra.mxu0 %v3471_v35  ;;  %3346 = vmatprep.subr.bf16.mxu1 %v3345_v36  ;;  %v832_v16 = vld [vmem:[%s5695_s1 + $0x540] sm:$0xff]  ;;  %v3485_v18 = vpack.c.bf16 %v835_v10, %v833_v9  ;;  %v834_v19 = vld [vmem:[%s5695_s1 + $0x550] sm:$0xff]  ;;  %v709_v20 = vld [vmem:[%s5695_s1 + $0x168] sm:$0xff]  ;;  %v3359_v25 = vpack.c.bf16 %v706_v15, %v704_v14 }
  0x23   : > { %241 = vperm.xlu0 %3778, %v4104_v23   ;;  %327 = vperm.xlu1 %3780, %v4104_v23   ;;  %v711_v21 = vld [vmem:[%s5695_s1 + $0x178] sm:$0xff]  ;;  %v837_v22 = vld [vmem:[%s5695_s1 + $0x568] sm:$0xff]  ;;  %v3487_v26 = vpack.c.bf16 %v834_v19, %v832_v16  ;;  %v708_v28 = vld [vmem:[%s5695_s1 + $0x160] sm:$0xff] }
  0x24   : > { %3474 = vmatprep.subr.bf16.mxu0 %v3473_v37  ;;  %v839_v24 = vld [vmem:[%s5695_s1 + $0x578] sm:$0xff]  ;;  %v3361_v27 = vpack.c.bf16 %v711_v21, %v709_v20  ;;  %v710_v29 = vld [vmem:[%s5695_s1 + $0x170] sm:$0xff]  ;;  %v836_v30 = vld [vmem:[%s5695_s1 + $0x560] sm:$0xff] }
  0x25   : > { %3348 = vmatpush1.bf16.msra.mxu1 %v3347_v48  ;;  %v3489_v31 = vpack.c.bf16 %v839_v24, %v837_v22  ;;  %v713_v32 = vld [vmem:[%s5695_s1 + $0x188] sm:$0xff]  ;;  %v715_v33 = vld [vmem:[%s5695_s1 + $0x198] sm:$0xff]  ;;  %v3363_v36 = vpack.c.bf16 %v710_v29, %v708_v28  ;;  %v712_v39 = vld [vmem:[%s5695_s1 + $0x180] sm:$0xff] }
  0x26   : > { %3476 = vmatpush1.bf16.msra.mxu0 %v3475_v49  ;;  %3350 = vmatprep.subr.bf16.mxu1 %v3349_v50  ;;  %v841_v34 = vld [vmem:[%s5695_s1 + $0x588] sm:$0xff]  ;;  %v843_v35 = vld [vmem:[%s5695_s1 + $0x598] sm:$0xff]  ;;  %v3365_v38 = vpack.c.bf16 %v715_v33, %v713_v32  ;;  %v842_v43 = vld [vmem:[%s5695_s1 + $0x590] sm:$0xff] }
  0x27   : > { %3779 = vset.pattern.permute.xlu0 %v3885_v40  ;;  %3781 = vset.pattern.permute.xlu1 %v3886_v41  ;;  %v714_v40 = vld [vmem:[%s5695_s1 + $0x190] sm:$0xff]  ;;  %v840_v41 = vld [vmem:[%s5695_s1 + $0x580] sm:$0xff]  ;;  %v3493_v42 = vpack.c.bf16 %v843_v35, %v841_v34  ;;  %v717_v44 = vld [vmem:[%s5695_s1 + $0x1a8] sm:$0xff] }
  0x28   : > { %284 = vperm.xlu0 %3779, %v4104_v23   ;;  %370 = vperm.xlu1 %3781, %v4104_v23   ;;  %v719_v45 = vld [vmem:[%s5695_s1 + $0x1b8] sm:$0xff]  ;;  %v845_v46 = vld [vmem:[%s5695_s1 + $0x5a8] sm:$0xff]  ;;  %v3367_v48 = vpack.c.bf16 %v714_v40, %v712_v39  ;;  %v3495_v49 = vpack.c.bf16 %v842_v43, %v840_v41  ;;  %v718_v52 = vld [vmem:[%s5695_s1 + $0x1b0] sm:$0xff] }
  0x29   : > { %3478 = vmatprep.subr.bf16.mxu0 %v3477_v51  ;;  %3352 = vmatpush1.bf16.msra.mxu1 %v3351_v62  ;;  %v847_v47 = vld [vmem:[%s5695_s1 + $0x5b8] sm:$0xff]  ;;  %v3369_v50 = vpack.c.bf16 %v719_v45, %v717_v44  ;;  %v716_v51 = vld [vmem:[%s5695_s1 + $0x1a0] sm:$0xff]  ;;  %v849_v58 = vld [vmem:[%s5695_s1 + $0x5c8] sm:$0xff] }
  0x2a   : > { %3480 = vmatpush1.bf16.msra.mxu0 %v3479_v63  ;;  %3354 = vmatprep.subr.bf16.mxu1 %v3353_v0  ;;  %v844_v53 = vld [vmem:[%s5695_s1 + $0x5a0] sm:$0xff]  ;;  %v3497_v54 = vpack.c.bf16 %v847_v47, %v845_v46  ;;  %v723_v57 = vld [vmem:[%s5695_s1 + $0x1d8] sm:$0xff]  ;;  %v3371_v60 = vpack.c.bf16 %v718_v52, %v716_v51  ;;  %v722_v0 = vld [vmem:[%s5695_s1 + $0x1d0] sm:$0xff] }
  0x2b   : > { %3482 = vmatprep.subr.bf16.mxu0 %v3481_v3  ;;  %v851_v59 = vld [vmem:[%s5695_s1 + $0x5d8] sm:$0xff]  ;;  %v720_v63 = vld [vmem:[%s5695_s1 + $0x1c0] sm:$0xff]  ;;  %v850_v3 = vld [vmem:[%s5695_s1 + $0x5d0] sm:$0xff] }
  0x2c   : > { %3782 = vset.pattern.permute.xlu1 %v3887_v55  ;;  %3783 = vset.pattern.permute.xlu0 %v3888_v56  ;;  %v846_v55 = vld [vmem:[%s5695_s1 + $0x5b0] sm:$0xff]  ;;  %v721_v56 = vld [vmem:[%s5695_s1 + $0x1c8] sm:$0xff]  ;;  %v848_v1 = vld [vmem:[%s5695_s1 + $0x5c0] sm:$0xff]  ;;  %v3501_v2 = vpack.c.bf16 %v851_v59, %v849_v58  ;;  %v3375_v8 = vpack.c.bf16 %v722_v0, %v720_v63 }
  0x2d   : > { %413 = vperm.xlu1 %3782, %v4104_v23   ;;  %456 = vperm.xlu0 %3783, %v4104_v23   ;;  %v3499_v61 = vpack.c.bf16 %v846_v55, %v844_v53  ;;  %v3373_v62 = vpack.c.bf16 %v723_v57, %v721_v56  ;;  %v725_v4 = vld [vmem:[%s5695_s1 + $0x1e8] sm:$0xff]  ;;  %v727_v5 = vld [vmem:[%s5695_s1 + $0x1f8] sm:$0xff]  ;;  %v3503_v9 = vpack.c.bf16 %v850_v3, %v848_v1  ;;  %v854_v15 = vld [vmem:[%s5695_s1 + $0x5f0] sm:$0xff] }
  0x2e   : > { %3356 = vmatpush1.bf16.msra.mxu1 %v3355_v12  ;;  %3484 = vmatpush1.bf16.msra.mxu0 %v3483_v13  ;;  %v853_v6 = vld [vmem:[%s5695_s1 + $0x5e8] sm:$0xff]  ;;  %v3377_v10 = vpack.c.bf16 %v727_v5, %v725_v4  ;;  %v726_v12 = vld [vmem:[%s5695_s1 + $0x1f0] sm:$0xff]  ;;  %v852_v13 = vld [vmem:[%s5695_s1 + $0x5e0] sm:$0xff] }
  0x2f   : > { %3358 = vmatprep.subr.bf16.mxu1 %v3357_v17  ;;  %3486 = vmatprep.subr.bf16.mxu0 %v3485_v18  ;;  %v729_v16 = vld [vmem:[%s5695_s1 + $0x208] sm:$0xff]  ;;  %v731_v17 = vld [vmem:[%s5695_s1 + $0x218] sm:$0xff]  ;;  %v3507_v21 = vpack.c.bf16 %v854_v15, %v852_v13  ;;  %v730_v28 = vld [vmem:[%s5695_s1 + $0x210] sm:$0xff] }
  0x30   : > { %v857_v18 = vld [vmem:[%s5695_s1 + $0x608] sm:$0xff]  ;;  %v859_v19 = vld [vmem:[%s5695_s1 + $0x618] sm:$0xff]  ;;  %v3381_v22 = vpack.c.bf16 %v731_v17, %v729_v16  ;;  %v856_v29 = vld [vmem:[%s5695_s1 + $0x600] sm:$0xff] }
  0x31   : > { %3784 = vset.pattern.permute.xlu1 %v3889_v7  ;;  %3806 = vset.pattern.permute.xlu0 %v3890_v11  ;;  %v855_v7 = vld [vmem:[%s5695_s1 + $0x5f8] sm:$0xff]  ;;  %v3509_v24 = vpack.c.bf16 %v859_v19, %v857_v18  ;;  %v861_v35 = vld [vmem:[%s5695_s1 + $0x628] sm:$0xff]  ;;  %v734_v43 = vld [vmem:[%s5695_s1 + $0x230] sm:$0xff] }
  0x32   : > { %499 = vperm.xlu1 %3784, %v4104_v23   ;;  %3360 = vmatpush1.bf16.msra.mxu1 %v3359_v25  ;;  %v3505_v14 = vpack.c.bf16 %v855_v7, %v853_v6  ;;  %v229_v25 = vlaneseq  ;;  %v735_v34 = vld [vmem:[%s5695_s1 + $0x238] sm:$0xff]  ;;  %v860_v44 = vld [vmem:[%s5695_s1 + $0x620] sm:$0xff]  ;;  %v862_v45 = vld [vmem:[%s5695_s1 + $0x630] sm:$0xff] }
  0x33   : > { %3488 = vmatpush1.bf16.msra.mxu0 %v3487_v26  ;;  %3362 = vmatprep.subr.bf16.mxu1 %v3361_v27  ;;  %v728_v27 = vld [vmem:[%s5695_s1 + $0x200] sm:$0xff]  ;;  %v737_v47 = vld [vmem:[%s5695_s1 + $0x248] sm:$0xff]  ;;  %v867_v51 = vld [vmem:[%s5695_s1 + $0x658] sm:$0xff]  ;;  %v3515_v53 = vpack.c.bf16 %v862_v45, %v860_v44 }
  0x34   : > { %3490 = vmatprep.subr.bf16.mxu0 %v3489_v31  ;;  %v4354_v26 = vand.u32 127, %v229_v25  ;;  %v733_v31 = vld [vmem:[%s5695_s1 + $0x228] sm:$0xff]  ;;  %v738_v55 = vld [vmem:[%s5695_s1 + $0x250] sm:$0xff]  ;;  %v864_v59 = vld [vmem:[%s5695_s1 + $0x640] sm:$0xff] }
  0x35   : > { %v3385_v40 = vpack.c.bf16 %v735_v34, %v733_v31  ;;  %v869_v1 = vld [vmem:[%s5695_s1 + $0x668] sm:$0xff]  ;;  %v740_v4 = vld [vmem:[%s5695_s1 + $0x260] sm:$0xff]  ;;  %v742_v5 = vld [vmem:[%s5695_s1 + $0x270] sm:$0xff] }
  0x36   : > { %3785 = vset.pattern.permute.xlu1 %v3890_v11  ;;  %3364 = vmatpush1.bf16.msra.mxu1 %v3363_v36  ;;  %v724_v11 = vld [vmem:[%s5695_s1 + $0x1e0] sm:$0xff]  ;;  %v4375_v32 = vadd.s32 640, %v4354_v26  ;;  %v4378_v33 = vadd.s32 512, %v4354_v26  ;;  %v863_v36 = vld [vmem:[%s5695_s1 + $0x638] sm:$0xff]  ;;  %v873_v13 = vld [vmem:[%s5695_s1 + $0x688] sm:$0xff] }
  0x37   : > { %542 = vperm.xlu1 %3785, %v4104_v23   ;;  %v838_v23 = vld [vmem:[%s5695_s1 + $0x570] sm:$0xff]  ;;  %3366 = vmatprep.subr.bf16.mxu1 %v3365_v38  ;;  %v3379_v20 = vpack.c.bf16 %v726_v12, %v724_v11  ;;  %v3383_v38 = vpack.c.bf16 %v730_v28, %v728_v27  ;;  %v3513_v41 = vpack.c.bf16 %v863_v36, %v861_v35  ;;  %v868_v7 = vld [vmem:[%s5695_s1 + $0x660] sm:$0xff]  ;;  %v747_v11 = vld [vmem:[%s5695_s1 + $0x298] sm:$0xff] }
  0x38   : > { %v3491_v37 = vpack.c.bf16 %v838_v23, %v836_v30  ;;  %v858_v30 = vld [vmem:[%s5695_s1 + $0x610] sm:$0xff]  ;;  %v4372_v23 = vadd.s32 128, %v4354_v26  ;;  %v3395_v12 = vpack.c.bf16 %v742_v5, %v740_v4  ;;  %v744_v16 = vld [vmem:[%s5695_s1 + $0x280] sm:$0xff]  ;;  %v751_v25 = vld [vmem:[%s5695_s1 + $0x2b8] sm:$0xff] }
  0x39   : > { %v3511_v39 = vpack.c.bf16 %v858_v30, %v856_v29  ;;  %v746_v17 = vld [vmem:[%s5695_s1 + $0x290] sm:$0xff]  ;;  %v877_v28 = vld [vmem:[%s5695_s1 + $0x6a8] sm:$0xff]  ;;  %v879_v29 = vld [vmem:[%s5695_s1 + $0x6b8] sm:$0xff] }
  0x3a   : > { %3492 = vmatpush1.bf16.msra.mxu0 %v3491_v37  ;;  %3368 = vmatpush1.bf16.msra.mxu1 %v3367_v48  ;;  %v3891_v48 = vmov 1.0   ;;  %v3399_v27 = vpack.c.bf16 %v746_v17, %v744_v16  ;;  %v748_v31 = vld [vmem:[%s5695_s1 + $0x2a0] sm:$0xff]  ;;  %v750_v34 = vld [vmem:[%s5695_s1 + $0x2b0] sm:$0xff]  ;;  %v881_v45 = vld [vmem:[%s5695_s1 + $0x6c8] sm:$0xff]  ;;  %v4737_v16 = vadd.s32 384, %v4354_v26  ;;  %v4740_v17 = vadd.s32 896, %v4354_v26 }
  0x3b   : > { %3494 = vmatprep.subr.bf16.mxu0 %v3493_v42  ;;  %3370 = vmatprep.subr.bf16.mxu1 %v3369_v50  ;;  %v732_v42 = vld [vmem:[%s5695_s1 + $0x220] sm:$0xff]  ;;  %v865_v50 = vld [vmem:[%s5695_s1 + $0x648] sm:$0xff]  ;;  %v886_v5 = vld [vmem:[%s5695_s1 + $0x6f0] sm:$0xff] }
  0x3c   : > { %v3387_v52 = vpack.c.bf16 %v734_v43, %v732_v42  ;;  %v3517_v58 = vpack.c.bf16 %v867_v51, %v865_v50  ;;  %v755_v42 = vld [vmem:[%s5695_s1 + $0x2d8] sm:$0xff]  ;;  %v3403_v43 = vpack.c.bf16 %v750_v34, %v748_v31  ;;  %v752_v50 = vld [vmem:[%s5695_s1 + $0x2c0] sm:$0xff]  ;;  %v754_v51 = vld [vmem:[%s5695_s1 + $0x2d0] sm:$0xff] }
  0x3d   : > { %v884_v4 = vld [vmem:[%s5695_s1 + $0x6e0] sm:$0xff]  ;;  %v894_v34 = vld [vmem:[%s5695_s1 + $0x730] sm:$0xff] }
  0x3e   : > { %3496 = vmatpush1.bf16.msra.mxu0 %v3495_v49  ;;  %3372 = vmatpush1.bf16.msra.mxu1 %v3371_v60  ;;  %v739_v49 = vld [vmem:[%s5695_s1 + $0x258] sm:$0xff]  ;;  %v866_v60 = vld [vmem:[%s5695_s1 + $0x650] sm:$0xff]  ;;  %v892_v31 = vld [vmem:[%s5695_s1 + $0x720] sm:$0xff] }
  0x3f   : > { %3498 = vmatprep.subr.bf16.mxu0 %v3497_v54  ;;  %3374 = vmatprep.subr.bf16.mxu1 %v3373_v62  ;;  %v736_v54 = vld [vmem:[%s5695_s1 + $0x240] sm:$0xff]  ;;  %v3389_v57 = vpack.c.bf16 %v739_v49, %v737_v47  ;;  %v743_v62 = vld [vmem:[%s5695_s1 + $0x278] sm:$0xff]  ;;  %v3519_v3 = vpack.c.bf16 %v866_v60, %v864_v59  ;;  %v3407_v59 = vpack.c.bf16 %v754_v51, %v752_v50  ;;  %v885_v60 = vld [vmem:[%s5695_s1 + $0x6e8] sm:$0xff] }
  0x40   : > { %v3391_v63 = vpack.c.bf16 %v738_v55, %v736_v54  ;;  %v883_v47 = vld [vmem:[%s5695_s1 + $0x6d8] sm:$0xff]  ;;  %v882_v54 = vld [vmem:[%s5695_s1 + $0x6d0] sm:$0xff]  ;;  %v896_v50 = vld [vmem:[%s5695_s1 + $0x740] sm:$0xff] }
  0x41   : > { %v3533_v55 = vpack.c.bf16 %v883_v47, %v881_v45  ;;  %v770_v45 = vld [vmem:[%s5695_s1 + $0x350] sm:$0xff] }
  0x42   : > { %3500 = vmatpush1.bf16.msra.mxu0 %v3499_v61  ;;  %3376 = vmatpush1.bf16.msra.mxu1 %v3375_v8  ;;  %v741_v61 = vld [vmem:[%s5695_s1 + $0x268] sm:$0xff]  ;;  %v870_v8 = vld [vmem:[%s5695_s1 + $0x670] sm:$0xff] }
  0x43   : > { %3502 = vmatprep.subr.bf16.mxu0 %v3501_v2  ;;  %3378 = vmatprep.subr.bf16.mxu1 %v3377_v10  ;;  %v871_v2 = vld [vmem:[%s5695_s1 + $0x678] sm:$0xff]  ;;  %v3393_v6 = vpack.c.bf16 %v743_v62, %v741_v61  ;;  %v745_v10 = vld [vmem:[%s5695_s1 + $0x288] sm:$0xff]  ;;  %v3523_v15 = vpack.c.bf16 %v870_v8, %v868_v7  ;;  %v898_v51 = vld [vmem:[%s5695_s1 + $0x750] sm:$0xff] }
  0x44   : > { %v3397_v19 = vpack.c.bf16 %v747_v11, %v745_v10  ;;  %v887_v61 = vld [vmem:[%s5695_s1 + $0x6f8] sm:$0xff]  ;;  %v761_v7 = vld [vmem:[%s5695_s1 + $0x308] sm:$0xff] }
  0x45   : > { %v889_v10 = vld [vmem:[%s5695_s1 + $0x708] sm:$0xff]  ;;  %v891_v11 = vld [vmem:[%s5695_s1 + $0x718] sm:$0xff] }
  0x46   : > { %3504 = vmatpush1.bf16.msra.mxu0 %v3503_v9  ;;  %3380 = vmatpush1.bf16.msra.mxu1 %v3379_v20  ;;  %v3521_v9 = vpack.c.bf16 %v871_v2, %v869_v1  ;;  %v872_v20 = vld [vmem:[%s5695_s1 + $0x680] sm:$0xff]  ;;  %v758_v1 = vld [vmem:[%s5695_s1 + $0x2f0] sm:$0xff] }
  0x47   : > { %3506 = vmatprep.subr.bf16.mxu0 %v3505_v14  ;;  %3382 = vmatprep.subr.bf16.mxu1 %v3381_v22  ;;  %v875_v14 = vld [vmem:[%s5695_s1 + $0x698] sm:$0xff] }
  0x48   : > { %v3525_v22 = vpack.c.bf16 %v875_v14, %v873_v13  ;;  %v760_v13 = vld [vmem:[%s5695_s1 + $0x300] sm:$0xff]  ;;  %v762_v14 = vld [vmem:[%s5695_s1 + $0x310] sm:$0xff] }
  0x4a   : > { %3508 = vmatpush1.bf16.msra.mxu0 %v3507_v21  ;;  %v874_v21 = vld [vmem:[%s5695_s1 + $0x690] sm:$0xff] }
  0x4b   : > { %3510 = vmatprep.subr.bf16.mxu0 %v3509_v24  ;;  %v749_v24 = vld [vmem:[%s5695_s1 + $0x2a8] sm:$0xff]  ;;  %v3527_v30 = vpack.c.bf16 %v874_v21, %v872_v20  ;;  %v767_v21 = vld [vmem:[%s5695_s1 + $0x338] sm:$0xff] }
  0x4c   : > { %v3401_v36 = vpack.c.bf16 %v751_v25, %v749_v24  ;;  %v765_v20 = vld [vmem:[%s5695_s1 + $0x328] sm:$0xff]  ;;  %v895_v24 = vld [vmem:[%s5695_s1 + $0x738] sm:$0xff] }
  0xa2   : > { %v4389_v37 = vpop.permute.xlu0 %241  ;;  %v4411_v46 = vpop.permute.xlu1 %327 }
  0xa3   : > { %vm244_vm0 = vcmp.eq.s32.totalorder %v4372_v23, %v4389_v37  ;;  %vm248_vm1 = vcmp.eq.s32.totalorder %v4375_v32, %v4389_v37  ;;  %vm243_vm2 = vcmp.eq.s32.totalorder %v4354_v26, %v4389_v37  ;;  %vm247_vm3 = vcmp.eq.s32.totalorder %v4378_v33, %v4389_v37 }
  0xa4   : > { %3053 = vmatprep.mubr.msk.f32.mxu1 %vm244_vm0, %v3891_v48  ;;  %3085 = vmatprep.mubr.msk.f32.mxu0 %vm248_vm1, %v3891_v48  ;;  %vm330_vm8 = vcmp.eq.s32.totalorder %v4372_v23, %v4411_v46  ;;  %vm334_vm9 = vcmp.eq.s32.totalorder %v4375_v32, %v4411_v46  ;;  %vm329_vm10 = vcmp.eq.s32.totalorder %v4354_v26, %v4411_v46 }
  0xa5   : > { %3054 = vmatmul.mubr.msk.f32.vlgmr.msra.gmra.mrb[0].mxu1 %vm243_vm2, %v3891_v48  ;;  %3086 = vmatmul.mubr.msk.f32.vlgmr.msra.gmra.mrb[0].mxu0 %vm247_vm3, %v3891_v48  ;;  %vm333_vm11 = vcmp.eq.s32.totalorder %v4378_v33, %v4411_v46 }
  0xa6   : > { %3384 = vmatpush1.bf16.msra.mxu1 %v3383_v38  ;;  %3512 = vmatpush1.bf16.msra.mxu0 %v3511_v39  ;;  %v876_v38 = vld [vmem:[%s5695_s1 + $0x6a0] sm:$0xff]  ;;  %v878_v39 = vld [vmem:[%s5695_s1 + $0x6b0] sm:$0xff] }
  0xa7   : > { %v4435_v56 = vpop.permute.xlu0 %284  ;;  %3386 = vmatprep.subr.bf16.mxu1 %v3385_v40  ;;  %3514 = vmatprep.subr.bf16.mxu0 %v3513_v41  ;;  %v4459_v0 = vpop.permute.xlu1 %370  ;;  %v3529_v40 = vpack.c.bf16 %v879_v29, %v877_v28  ;;  %v753_v41 = vld [vmem:[%s5695_s1 + $0x2c8] sm:$0xff]  ;;  %v3531_v49 = vpack.c.bf16 %v878_v39, %v876_v38  ;;  %v3417_v29 = vpack.c.bf16 %v767_v21, %v765_v20  ;;  %v771_v38 = vld [vmem:[%s5695_s1 + $0x358] sm:$0xff] }
  0xa8   : > { %vm287_vm4 = vcmp.eq.s32.totalorder %v4372_v23, %v4435_v56  ;;  %vm291_vm5 = vcmp.eq.s32.totalorder %v4375_v32, %v4435_v56  ;;  %vm286_vm6 = vcmp.eq.s32.totalorder %v4354_v26, %v4435_v56  ;;  %vm290_vm7 = vcmp.eq.s32.totalorder %v4378_v33, %v4435_v56  ;;  %v897_v39 = vld [vmem:[%s5695_s1 + $0x748] sm:$0xff]  ;;  %v911_v21 = vld [vmem:[%s5695_s1 + $0x7b8] sm:$0xff] }
  0xa9   : > { %3055 = vmatprep.mubr.msk.f32.mxu1 %vm287_vm4, %v3891_v48  ;;  %3087 = vmatprep.mubr.msk.f32.mxu0 %vm291_vm5, %v3891_v48  ;;  %vm373_vm12 = vcmp.eq.s32.totalorder %v4372_v23, %v4459_v0  ;;  %vm377_vm13 = vcmp.eq.s32.totalorder %v4375_v32, %v4459_v0  ;;  %vm372_vm14 = vcmp.eq.s32.totalorder %v4354_v26, %v4459_v0  ;;  %v909_v20 = vld [vmem:[%s5695_s1 + $0x7a8] sm:$0xff] }
  0xaa   : > { %3388 = vmatpush1.bf16.msra.mxu1 %v3387_v52  ;;  %3516 = vmatpush1.bf16.msra.mxu0 %v3515_v53  ;;  %vm376_vm15 = vcmp.eq.s32.totalorder %v4378_v33, %v4459_v0  ;;  %v3405_v52 = vpack.c.bf16 %v755_v42, %v753_v41  ;;  %v880_v53 = vld [vmem:[%s5695_s1 + $0x6c0] sm:$0xff]  ;;  %v3547_v42 = vpack.c.bf16 %v894_v34, %v892_v31  ;;  %v913_v31 = vld [vmem:[%s5695_s1 + $0x7c8] sm:$0xff]  ;;  %v915_v34 = vld [vmem:[%s5695_s1 + $0x7d8] sm:$0xff] }
  0xab   : > { %3056 = vmatmul.mubr.msk.f32.gmra.mrb[2].mxu1 %vm286_vm6, %v3891_v48  ;;  %3088 = vmatmul.mubr.msk.f32.gmra.mrb[2].mxu0 %vm290_vm7, %v3891_v48  ;;  %v3535_v62 = vpack.c.bf16 %v882_v54, %v880_v53  ;;  %v775_v53 = vld [vmem:[%s5695_s1 + $0x378] sm:$0xff]  ;;  %v901_v54 = vld [vmem:[%s5695_s1 + $0x768] sm:$0xff] }
  0xac   : > { %3390 = vmatprep.subr.bf16.mxu1 %v3389_v57  ;;  %3518 = vmatprep.subr.bf16.mxu0 %v3517_v58  ;;  %v4533_v18 = vpop.permute.xlu1 %413  ;;  %v4583_v35 = vpop.permute.xlu0 %456  ;;  %v757_v57 = vld [vmem:[%s5695_s1 + $0x2e8] sm:$0xff]  ;;  %v759_v58 = vld [vmem:[%s5695_s1 + $0x2f8] sm:$0xff] }
  0xad   : > { %3057 = vmatprep.mubr.msk.f32.mxu1 %vm330_vm8, %v3891_v48  ;;  %3089 = vmatprep.mubr.msk.f32.mxu0 %vm334_vm9, %v3891_v48  ;;  %vm416_vm0 = vcmp.eq.s32.totalorder %v4372_v23, %v4533_v18  ;;  %vm420_vm1 = vcmp.eq.s32.totalorder %v4375_v32, %v4533_v18  ;;  %vm415_vm2 = vcmp.eq.s32.totalorder %v4354_v26, %v4533_v18 }
  0xae   : > { %3392 = vmatpush1.bf16.msra.mxu1 %v3391_v63  ;;  %3520 = vmatpush1.bf16.msra.mxu0 %v3519_v3  ;;  %vm419_vm3 = vcmp.eq.s32.totalorder %v4378_v33, %v4533_v18  ;;  %vm459_vm4 = vcmp.eq.s32.totalorder %v4372_v23, %v4583_v35  ;;  %vm463_vm5 = vcmp.eq.s32.totalorder %v4375_v32, %v4583_v35  ;;  %v756_v63 = vld [vmem:[%s5695_s1 + $0x2e0] sm:$0xff] }
  0xaf   : > { %3058 = vmatmul.mubr.msk.f32.gmra.mrb[4].mxu1 %vm329_vm10, %v3891_v48  ;;  %3090 = vmatmul.mubr.msk.f32.gmra.mrb[4].mxu0 %vm333_vm11, %v3891_v48  ;;  %vm458_vm6 = vcmp.eq.s32.totalorder %v4354_v26, %v4583_v35  ;;  %vm462_vm7 = vcmp.eq.s32.totalorder %v4378_v33, %v4583_v35  ;;  %v3409_v3 = vpack.c.bf16 %v759_v58, %v757_v57 }
  0xb0   : > { %3394 = vmatprep.subr.bf16.mxu1 %v3393_v6  ;;  %3522 = vmatprep.subr.bf16.mxu0 %v3521_v9  ;;  %v3537_v6 = vpack.c.bf16 %v887_v61, %v885_v60  ;;  %v3411_v8 = vpack.c.bf16 %v758_v1, %v756_v63  ;;  %v763_v9 = vld [vmem:[%s5695_s1 + $0x318] sm:$0xff]  ;;  %v3551_v58 = vpack.c.bf16 %v898_v51, %v896_v50  ;;  %v774_v60 = vld [vmem:[%s5695_s1 + $0x370] sm:$0xff]  ;;  %v900_v63 = vld [vmem:[%s5695_s1 + $0x760] sm:$0xff] }
  0xb1   : > { %3059 = vmatprep.mubr.msk.f32.mxu1 %vm373_vm12, %v3891_v48  ;;  %3091 = vmatprep.mubr.msk.f32.mxu0 %vm377_vm13, %v3891_v48  ;;  %v4609_v44 = vpop.permute.xlu1 %499  ;;  %v3413_v25 = vpack.c.bf16 %v763_v9, %v761_v7  ;;  %v902_v1 = vld [vmem:[%s5695_s1 + $0x770] sm:$0xff]  ;;  %v776_v9 = vld [vmem:[%s5695_s1 + $0x380] sm:$0xff]  ;;  %v917_v50 = vld [vmem:[%s5695_s1 + $0x7e8] sm:$0xff] }
  0xb2   : > { %3396 = vmatpush1.bf16.msra.mxu1 %v3395_v12  ;;  %3524 = vmatpush1.bf16.msra.mxu0 %v3523_v15  ;;  %vm502_vm8 = vcmp.eq.s32.totalorder %v4372_v23, %v4609_v44  ;;  %vm506_vm9 = vcmp.eq.s32.totalorder %v4375_v32, %v4609_v44  ;;  %vm501_vm10 = vcmp.eq.s32.totalorder %v4354_v26, %v4609_v44  ;;  %v888_v15 = vld [vmem:[%s5695_s1 + $0x700] sm:$0xff]  ;;  %v919_v51 = vld [vmem:[%s5695_s1 + $0x7f8] sm:$0xff] }
  0xb3   : > { %3060 = vmatmul.mubr.msk.f32.gmra.mrb[6].mxu1 %vm372_vm14, %v3891_v48  ;;  %3092 = vmatmul.mubr.msk.f32.gmra.mrb[6].mxu0 %vm376_vm15, %v3891_v48  ;;  %vm505_vm11 = vcmp.eq.s32.totalorder %v4378_v33, %v4609_v44  ;;  %v3539_v12 = vpack.c.bf16 %v886_v5, %v884_v4  ;;  %v779_v4 = vld [vmem:[%s5695_s1 + $0x398] sm:$0xff]  ;;  %v905_v5 = vld [vmem:[%s5695_s1 + $0x788] sm:$0xff] }
  0xb4   : > { %3398 = vmatprep.subr.bf16.mxu1 %v3397_v19  ;;  %3526 = vmatprep.subr.bf16.mxu0 %v3525_v22  ;;  %v890_v19 = vld [vmem:[%s5695_s1 + $0x710] sm:$0xff]  ;;  %v893_v22 = vld [vmem:[%s5695_s1 + $0x728] sm:$0xff] }
  0xb5   : > { %3061 = vmatprep.mubr.msk.f32.mxu1 %vm416_vm0, %v3891_v48  ;;  %3093 = vmatprep.mubr.msk.f32.mxu0 %vm420_vm1, %v3891_v48  ;;  %v3543_v28 = vpack.c.bf16 %v890_v19, %v888_v15  ;;  %vm246_vm0 = vcmp.eq.s32.totalorder %v4737_v16, %v4389_v37  ;;  %vm250_vm1 = vcmp.eq.s32.totalorder %v4740_v17, %v4389_v37  ;;  %v781_v15 = vld [vmem:[%s5695_s1 + $0x3a8] sm:$0xff]  ;;  %v783_v19 = vld [vmem:[%s5695_s1 + $0x3b8] sm:$0xff] }
  0xb6   : > { %3400 = vmatpush1.bf16.msra.mxu1 %v3399_v27  ;;  %3528 = vmatpush1.bf16.msra.mxu0 %v3527_v30  ;;  %v4683_v2 = vpop.permute.xlu1 %542  ;;  %v3415_v27 = vpack.c.bf16 %v762_v14, %v760_v13  ;;  %v764_v30 = vld [vmem:[%s5695_s1 + $0x320] sm:$0xff]  ;;  %v906_v14 = vld [vmem:[%s5695_s1 + $0x790] sm:$0xff] }
  0xb7   : > { %3062 = vmatmul.mubr.msk.f32.gmra.mrb[8].mxu1 %vm415_vm2, %v3891_v48  ;;  %3094 = vmatmul.mubr.msk.f32.gmra.mrb[8].mxu0 %vm419_vm3, %v3891_v48  ;;  %vm545_vm12 = vcmp.eq.s32.totalorder %v4372_v23, %v4683_v2  ;;  %vm549_vm13 = vcmp.eq.s32.totalorder %v4375_v32, %v4683_v2  ;;  %vm544_vm14 = vcmp.eq.s32.totalorder %v4354_v26, %v4683_v2  ;;  %v766_v23 = vld [vmem:[%s5695_s1 + $0x330] sm:$0xff]  ;;  %v904_v13 = vld [vmem:[%s5695_s1 + $0x780] sm:$0xff] }
  0xb8   : > { %3402 = vmatprep.subr.bf16.mxu1 %v3401_v36  ;;  %3530 = vmatprep.subr.bf16.mxu0 %v3529_v40  ;;  %vm548_vm15 = vcmp.eq.s32.totalorder %v4378_v33, %v4683_v2  ;;  %v3541_v33 = vpack.c.bf16 %v891_v11, %v889_v10  ;;  %v3545_v32 = vpack.c.bf16 %v895_v24, %v893_v22  ;;  %v769_v36 = vld [vmem:[%s5695_s1 + $0x348] sm:$0xff]  ;;  %v899_v40 = vld [vmem:[%s5695_s1 + $0x758] sm:$0xff]  ;;  %v778_v10 = vld [vmem:[%s5695_s1 + $0x390] sm:$0xff] }
  0xb9   : > { %3063 = vmatprep.mubr.msk.f32.mxu1 %vm459_vm4, %v3891_v48  ;;  %3095 = vmatprep.mubr.msk.f32.mxu0 %vm463_vm5, %v3891_v48  ;;  %v3419_v41 = vpack.c.bf16 %v766_v23, %v764_v30  ;;  %v3421_v47 = vpack.c.bf16 %v771_v38, %v769_v36  ;;  %v3431_v22 = vpack.c.bf16 %v778_v10, %v776_v9  ;;  %v910_v30 = vld [vmem:[%s5695_s1 + $0x7b0] sm:$0xff]  ;;  %v785_v23 = vld [vmem:[%s5695_s1 + $0x3c8] sm:$0xff]  ;;  %v927_v9 = vld [vmem:[%s5695_s1 + $0x838] sm:$0xff] }
  0xba   : > { %3404 = vmatpush1.bf16.msra.mxu1 %v3403_v43  ;;  %3532 = vmatpush1.bf16.msra.mxu0 %v3531_v49  ;;  %v768_v43 = vld [vmem:[%s5695_s1 + $0x340] sm:$0xff]  ;;  %v3549_v49 = vpack.c.bf16 %v899_v40, %v897_v39  ;;  %v3559_v24 = vpack.c.bf16 %v906_v14, %v904_v13  ;;  %v786_v40 = vld [vmem:[%s5695_s1 + $0x3d0] sm:$0xff]  ;;  %vm289_vm4 = vcmp.eq.s32.totalorder %v4737_v16, %v4435_v56  ;;  %v929_v14 = vld [vmem:[%s5695_s1 + $0x848] sm:$0xff] }
  0xbb   : > { %3064 = vmatmul.mubr.msk.f32.gmra.mrb[10].mxu1 %vm458_vm6, %v3891_v48  ;;  %3096 = vmatmul.mubr.msk.f32.gmra.mrb[10].mxu0 %vm462_vm7, %v3891_v48  ;;  %v3423_v57 = vpack.c.bf16 %v770_v45, %v768_v43  ;;  %v784_v39 = vld [vmem:[%s5695_s1 + $0x3c0] sm:$0xff]  ;;  %v914_v45 = vld [vmem:[%s5695_s1 + $0x7d0] sm:$0xff]  ;;  %vm293_vm5 = vcmp.eq.s32.totalorder %v4740_v17, %v4435_v56 }
  0xbc   : > { %3406 = vmatprep.subr.bf16.mxu1 %v3405_v52  ;;  %3534 = vmatprep.subr.bf16.mxu0 %v3533_v55  ;;  %v773_v52 = vld [vmem:[%s5695_s1 + $0x368] sm:$0xff]  ;;  %v903_v55 = vld [vmem:[%s5695_s1 + $0x778] sm:$0xff]  ;;  %v912_v43 = vld [vmem:[%s5695_s1 + $0x7c0] sm:$0xff] }
  0xbd   : > { %3065 = vmatprep.mubr.msk.f32.mxu1 %vm502_vm8, %v3891_v48  ;;  %3097 = vmatprep.mubr.msk.f32.mxu0 %vm506_vm9, %v3891_v48  ;;  %v3425_v61 = vpack.c.bf16 %v775_v53, %v773_v52  ;;  %v3439_v52 = vpack.c.bf16 %v786_v40, %v784_v39  ;;  %v3567_v53 = vpack.c.bf16 %v914_v45, %v912_v43  ;;  %v926_v13 = vld [vmem:[%s5695_s1 + $0x830] sm:$0xff]  ;;  %v943_v39 = vld [vmem:[%s5695_s1 + $0x8b8] sm:$0xff]  ;;  %v945_v45 = vld [vmem:[%s5695_s1 + $0x8c8] sm:$0xff] }
  0xbe   : > { %3408 = vmatpush1.bf16.msra.mxu1 %v3407_v59  ;;  %3536 = vmatpush1.bf16.msra.mxu0 %v3535_v62  ;;  %v772_v59 = vld [vmem:[%s5695_s1 + $0x360] sm:$0xff]  ;;  %v3553_v62 = vpack.c.bf16 %v903_v55, %v901_v54  ;;  %vm332_vm8 = vcmp.eq.s32.totalorder %v4737_v16, %v4411_v46  ;;  %vm336_vm9 = vcmp.eq.s32.totalorder %v4740_v17, %v4411_v46  ;;  %v942_v43 = vld [vmem:[%s5695_s1 + $0x8b0] sm:$0xff] }
  0xbf   : > { %3066 = vmatmul.mubr.msk.f32.gmra.mrb[12].mxu1 %vm501_vm10, %v3891_v48  ;;  %3098 = vmatmul.mubr.msk.f32.gmra.mrb[12].mxu0 %vm505_vm11, %v3891_v48  ;;  %v3427_v7 = vpack.c.bf16 %v774_v60, %v772_v59  ;;  %v788_v54 = vld [vmem:[%s5695_s1 + $0x3e0] sm:$0xff]  ;;  %v918_v60 = vld [vmem:[%s5695_s1 + $0x7f0] sm:$0xff] }
  0xc0   : > { %3410 = vmatprep.subr.bf16.mxu1 %v3409_v3  ;;  %3538 = vmatprep.subr.bf16.mxu0 %v3537_v6  ;;  %v777_v3 = vld [vmem:[%s5695_s1 + $0x388] sm:$0xff]  ;;  %v907_v6 = vld [vmem:[%s5695_s1 + $0x798] sm:$0xff]  ;;  %v916_v59 = vld [vmem:[%s5695_s1 + $0x7e0] sm:$0xff] }
  0xc1   : > { %3067 = vmatprep.mubr.msk.f32.mxu1 %vm545_vm12, %v3891_v48  ;;  %3099 = vmatprep.mubr.msk.f32.mxu0 %vm549_vm13, %v3891_v48  ;;  %v3429_v11 = vpack.c.bf16 %v779_v4, %v777_v3  ;;  %v4940_v4 = vadd.s32 256, %v4354_v26  ;;  %vm375_vm12 = vcmp.eq.s32.totalorder %v4737_v16, %v4459_v0  ;;  %vm379_vm13 = vcmp.eq.s32.totalorder %v4740_v17, %v4459_v0 }
  0xc2   : > { %3412 = vmatpush1.bf16.msra.mxu1 %v3411_v8  ;;  %3540 = vmatpush1.bf16.msra.mxu0 %v3539_v12  ;;  %v3555_v8 = vpack.c.bf16 %v902_v1, %v900_v63  ;;  %v3557_v12 = vpack.c.bf16 %v907_v6, %v905_v5  ;;  %v3571_v1 = vpack.c.bf16 %v918_v60, %v916_v59  ;;  %v4943_v5 = vadd.s32 768, %v4354_v26  ;;  %v920_v6 = vld [vmem:[%s5695_s1 + $0x800] sm:$0xff]  ;;  %v950_v59 = vld [vmem:[%s5695_s1 + $0x8f0] sm:$0xff] }
  0xc3   : > { %3068 = vmatmul.mubr.msk.f32.gmra.mrb[14].mxu1 %vm544_vm14, %v3891_v48  ;;  %3100 = vmatmul.mubr.msk.f32.gmra.mrb[14].mxu0 %vm548_vm15, %v3891_v48  ;;  %vm245_vm2 = vcmp.eq.s32.totalorder %v4940_v4, %v4389_v37  ;;  %vm288_vm6 = vcmp.eq.s32.totalorder %v4940_v4, %v4435_v56  ;;  %vm331_vm10 = vcmp.eq.s32.totalorder %v4940_v4, %v4411_v46  ;;  %v5118_v60 = vadd.s32 1152, %v4354_v26 }
  0xc4   : > { %3069 = vmatprep.mubr.msk.f32.mxu1 %vm246_vm0, %v3891_v48  ;;  %3101 = vmatprep.mubr.msk.f32.mxu0 %vm250_vm1, %v3891_v48  ;;  %vm249_vm3 = vcmp.eq.s32.totalorder %v4943_v5, %v4389_v37  ;;  %vm292_vm7 = vcmp.eq.s32.totalorder %v4943_v5, %v4435_v56  ;;  %vm335_vm11 = vcmp.eq.s32.totalorder %v4943_v5, %v4411_v46 }
  0xc5   : > { %3414 = vmatprep.subr.bf16.mxu1 %v3413_v25  ;;  %3542 = vmatprep.subr.bf16.mxu0 %v3541_v33  ;;  %v780_v25 = vld [vmem:[%s5695_s1 + $0x3a0] sm:$0xff]  ;;  %v782_v33 = vld [vmem:[%s5695_s1 + $0x3b0] sm:$0xff]  ;;  %vm374_vm14 = vcmp.eq.s32.totalorder %v4940_v4, %v4459_v0  ;;  %vm378_vm15 = vcmp.eq.s32.totalorder %v4943_v5, %v4459_v0  ;;  %vm418_vm0 = vcmp.eq.s32.totalorder %v4737_v16, %v4533_v18 }
  0xc6   : > { %3416 = vmatpush1.bf16.msra.mxu1 %v3415_v27  ;;  %3544 = vmatpush1.bf16.msra.mxu0 %v3543_v28  ;;  %v3433_v27 = vpack.c.bf16 %v783_v19, %v781_v15  ;;  %v3561_v28 = vpack.c.bf16 %v911_v21, %v909_v20  ;;  %v3435_v36 = vpack.c.bf16 %v782_v33, %v780_v25  ;;  %v931_v15 = vld [vmem:[%s5695_s1 + $0x858] sm:$0xff]  ;;  %v928_v21 = vld [vmem:[%s5695_s1 + $0x840] sm:$0xff] }
  0xc7   : > { %3418 = vmatprep.subr.bf16.mxu1 %v3417_v29  ;;  %3546 = vmatprep.subr.bf16.mxu0 %v3545_v32  ;;  %v908_v29 = vld [vmem:[%s5695_s1 + $0x7a0] sm:$0xff]  ;;  %v787_v32 = vld [vmem:[%s5695_s1 + $0x3d8] sm:$0xff]  ;;  %v3581_v20 = vpack.c.bf16 %v931_v15, %v929_v14  ;;  %vm422_vm1 = vcmp.eq.s32.totalorder %v4740_v17, %v4533_v18  ;;  %v962_v14 = vld [vmem:[%s5695_s1 + $0x950] sm:$0xff] }
  0xc8   : > { %v3563_v38 = vpack.c.bf16 %v910_v30, %v908_v29  ;;  %v935_v25 = vld [vmem:[%s5695_s1 + $0x878] sm:$0xff]  ;;  %v934_v29 = vld [vmem:[%s5695_s1 + $0x870] sm:$0xff]  ;;  %v937_v30 = vld [vmem:[%s5695_s1 + $0x888] sm:$0xff] }
  0xc9   : > { %v965_v15 = vld [vmem:[%s5695_s1 + $0x968] sm:$0xff] }
  0xca   : > { %3420 = vmatpush1.bf16.msra.mxu1 %v3419_v41  ;;  %3548 = vmatpush1.bf16.msra.mxu0 %v3547_v42  ;;  %v3437_v41 = vpack.c.bf16 %v787_v32, %v785_v23  ;;  %v3565_v42 = vpack.c.bf16 %v915_v34, %v913_v31  ;;  %v939_v23 = vld [vmem:[%s5695_s1 + $0x898] sm:$0xff]  ;;  %v936_v34 = vld [vmem:[%s5695_s1 + $0x880] sm:$0xff] }
  0xcb   : > { %3422 = vmatprep.subr.bf16.mxu1 %v3421_v47  ;;  %3550 = vmatprep.subr.bf16.mxu0 %v3549_v49  ;;  %v789_v47 = vld [vmem:[%s5695_s1 + $0x3e8] sm:$0xff]  ;;  %v791_v49 = vld [vmem:[%s5695_s1 + $0x3f8] sm:$0xff]  ;;  %v3589_v31 = vpack.c.bf16 %v939_v23, %v937_v30  ;;  %v970_v30 = vld [vmem:[%s5695_s1 + $0x990] sm:$0xff] }
  0xcc   : > { %v3441_v55 = vpack.c.bf16 %v791_v49, %v789_v47  ;;  %v947_v47 = vld [vmem:[%s5695_s1 + $0x8d8] sm:$0xff]  ;;  %v973_v23 = vld [vmem:[%s5695_s1 + $0x9a8] sm:$0xff] }
  0xce   : > { %3424 = vmatpush1.bf16.msra.mxu1 %v3423_v57  ;;  %3552 = vmatpush1.bf16.msra.mxu0 %v3551_v58  ;;  %v3569_v57 = vpack.c.bf16 %v919_v51, %v917_v50  ;;  %v790_v58 = vld [vmem:[%s5695_s1 + $0x3f0] sm:$0xff]  ;;  %v3597_v50 = vpack.c.bf16 %v947_v47, %v945_v45  ;;  %v944_v51 = vld [vmem:[%s5695_s1 + $0x8c0] sm:$0xff]  ;;  %v981_v47 = vld [vmem:[%s5695_s1 + $0x9e8] sm:$0xff] }
  0xcf   : > { %3426 = vmatprep.subr.bf16.mxu1 %v3425_v61  ;;  %3554 = vmatprep.subr.bf16.mxu0 %v3553_v62  ;;  %v921_v61 = vld [vmem:[%s5695_s1 + $0x808] sm:$0xff]  ;;  %v923_v62 = vld [vmem:[%s5695_s1 + $0x818] sm:$0xff]  ;;  %v3443_v63 = vpack.c.bf16 %v790_v58, %v788_v54  ;;  %v948_v58 = vld [vmem:[%s5695_s1 + $0x8e0] sm:$0xff] }
  0xd0   : > { %v3573_v3 = vpack.c.bf16 %v923_v62, %v921_v61  ;;  %v951_v54 = vld [vmem:[%s5695_s1 + $0x8f8] sm:$0xff]  ;;  %v953_v61 = vld [vmem:[%s5695_s1 + $0x908] sm:$0xff]  ;;  %v978_v45 = vld [vmem:[%s5695_s1 + $0x9d0] sm:$0xff] }
  0xd1   : > { %v955_v62 = vld [vmem:[%s5695_s1 + $0x918] sm:$0xff] }
  0xd2   : > { %3428 = vmatpush1.bf16.msra.mxu1 %v3427_v7  ;;  %3556 = vmatpush1.bf16.msra.mxu0 %v3555_v8  ;;  %v922_v7 = vld [vmem:[%s5695_s1 + $0x810] sm:$0xff]  ;;  %v925_v8 = vld [vmem:[%s5695_s1 + $0x828] sm:$0xff] }
  0xd3   : > { %3430 = vmatprep.subr.bf16.mxu1 %v3429_v11  ;;  %3558 = vmatprep.subr.bf16.mxu0 %v3557_v12  ;;  %v3575_v10 = vpack.c.bf16 %v922_v7, %v920_v6  ;;  %v3577_v11 = vpack.c.bf16 %v927_v9, %v925_v8  ;;  %v924_v12 = vld [vmem:[%s5695_s1 + $0x820] sm:$0xff]  ;;  %v958_v8 = vld [vmem:[%s5695_s1 + $0x930] sm:$0xff]  ;;  %v961_v9 = vld [vmem:[%s5695_s1 + $0x948] sm:$0xff] }
  0xd4   : > { %v3579_v19 = vpack.c.bf16 %v926_v13, %v924_v12  ;;  %v956_v7 = vld [vmem:[%s5695_s1 + $0x920] sm:$0xff] }
  0xd5   : > { %v960_v13 = vld [vmem:[%s5695_s1 + $0x940] sm:$0xff] }
  0xd6   : > { %3432 = vmatpush1.bf16.msra.mxu1 %v3431_v22  ;;  %3560 = vmatpush1.bf16.msra.mxu0 %v3559_v24  ;;  %v930_v22 = vld [vmem:[%s5695_s1 + $0x850] sm:$0xff]  ;;  %v933_v24 = vld [vmem:[%s5695_s1 + $0x868] sm:$0xff] }
  0xd7   : > { %3434 = vmatprep.subr.bf16.mxu1 %v3433_v27  ;;  %3562 = vmatprep.subr.bf16.mxu0 %v3561_v28  ;;  %v3583_v33 = vpack.c.bf16 %v930_v22, %v928_v21  ;;  %v3585_v27 = vpack.c.bf16 %v935_v25, %v933_v24  ;;  %v932_v28 = vld [vmem:[%s5695_s1 + $0x860] sm:$0xff]  ;;  %v966_v24 = vld [vmem:[%s5695_s1 + $0x970] sm:$0xff]  ;;  %v969_v25 = vld [vmem:[%s5695_s1 + $0x988] sm:$0xff] }
  0xd8   : > { %v3587_v32 = vpack.c.bf16 %v934_v29, %v932_v28  ;;  %v964_v22 = vld [vmem:[%s5695_s1 + $0x960] sm:$0xff] }
  0xd9   : > { %v968_v29 = vld [vmem:[%s5695_s1 + $0x980] sm:$0xff] }
  0xda   : > { %3436 = vmatpush1.bf16.msra.mxu1 %v3435_v36  ;;  %3564 = vmatpush1.bf16.msra.mxu0 %v3563_v38  ;;  %v938_v36 = vld [vmem:[%s5695_s1 + $0x890] sm:$0xff]  ;;  %v941_v38 = vld [vmem:[%s5695_s1 + $0x8a8] sm:$0xff] }
  0xdb   : > { %3438 = vmatprep.subr.bf16.mxu1 %v3437_v41  ;;  %3566 = vmatprep.subr.bf16.mxu0 %v3565_v42  ;;  %v3591_v40 = vpack.c.bf16 %v938_v36, %v936_v34  ;;  %v3593_v41 = vpack.c.bf16 %v943_v39, %v941_v38  ;;  %v940_v42 = vld [vmem:[%s5695_s1 + $0x8a0] sm:$0xff]  ;;  %v974_v38 = vld [vmem:[%s5695_s1 + $0x9b0] sm:$0xff]  ;;  %v977_v39 = vld [vmem:[%s5695_s1 + $0x9c8] sm:$0xff] }
  0xdc   : > { %v3595_v49 = vpack.c.bf16 %v942_v43, %v940_v42  ;;  %v972_v36 = vld [vmem:[%s5695_s1 + $0x9a0] sm:$0xff] }
  0xdd   : > { %v976_v43 = vld [vmem:[%s5695_s1 + $0x9c0] sm:$0xff] }
  0xde   : > { %3440 = vmatpush1.bf16.msra.mxu1 %v3439_v52  ;;  %3568 = vmatpush1.bf16.msra.mxu0 %v3567_v53  ;;  %v946_v52 = vld [vmem:[%s5695_s1 + $0x8d0] sm:$0xff]  ;;  %v949_v53 = vld [vmem:[%s5695_s1 + $0x8e8] sm:$0xff] }
  0xdf   : > { %3442 = vmatprep.subr.bf16.mxu1 %v3441_v55  ;;  %3570 = vmatprep.subr.bf16.mxu0 %v3569_v57  ;;  %v3599_v55 = vpack.c.bf16 %v946_v52, %v944_v51  ;;  %v3601_v57 = vpack.c.bf16 %v951_v54, %v949_v53  ;;  %v980_v52 = vld [vmem:[%s5695_s1 + $0x9e0] sm:$0xff]  ;;  %v982_v53 = vld [vmem:[%s5695_s1 + $0x9f0] sm:$0xff] }
  0xe0   : > { %v3635_v54 = vpack.c.bf16 %v982_v53, %v980_v52 }
  0xe2   : > { %3444 = vmatpush1.bf16.msra.mxu1 %v3443_v63  ;;  %3572 = vmatpush1.bf16.msra.mxu0 %v3571_v1  ;;  %v952_v63 = vld [vmem:[%s5695_s1 + $0x900] sm:$0xff]  ;;  %v954_v1 = vld [vmem:[%s5695_s1 + $0x910] sm:$0xff] }
  0xe3   : > { %3574 = vmatprep.subr.bf16.mxu0 %v3573_v3  ;;  %v957_v3 = vld [vmem:[%s5695_s1 + $0x928] sm:$0xff] }
  0xe5   : > { %3070 = vmatmul.mubr.msk.f32.vlgmr.msra.gmra.mrb[0].mxu1 %vm245_vm2, %v3891_v48  ;;  %3102 = vmatmul.mubr.msk.f32.vlgmr.msra.gmra.mrb[0].mxu0 %vm249_vm3, %v3891_v48  ;;  %vm417_vm2 = vcmp.eq.s32.totalorder %v4940_v4, %v4533_v18  ;;  %vm421_vm3 = vcmp.eq.s32.totalorder %v4943_v5, %v4533_v18 }
  0xe6   : > { %3071 = vmatprep.mubr.msk.f32.mxu1 %vm289_vm4, %v3891_v48  ;;  %3103 = vmatprep.mubr.msk.f32.mxu0 %vm293_vm5, %v3891_v48  ;;  %vm461_vm4 = vcmp.eq.s32.totalorder %v4737_v16, %v4583_v35  ;;  %vm465_vm5 = vcmp.eq.s32.totalorder %v4740_v17, %v4583_v35 }
  0xe7   : > { %3576 = vmatpush1.bf16.msra.mxu0 %v3575_v10  ;;  %v963_v10 = vld [vmem:[%s5695_s1 + $0x958] sm:$0xff] }
  0xe8   : > { %3578 = vmatprep.subr.bf16.mxu0 %v3577_v11  ;;  %v3611_v11 = vpack.c.bf16 %v958_v8, %v956_v7  ;;  %v3613_v12 = vpack.c.bf16 %v963_v10, %v961_v9 }
  0xe9   : > { %3072 = vmatmul.mubr.msk.f32.gmra.mrb[2].mxu1 %vm288_vm6, %v3891_v48  ;;  %3104 = vmatmul.mubr.msk.f32.gmra.mrb[2].mxu0 %vm292_vm7, %v3891_v48  ;;  %vm460_vm6 = vcmp.eq.s32.totalorder %v4940_v4, %v4583_v35  ;;  %vm464_vm7 = vcmp.eq.s32.totalorder %v4943_v5, %v4583_v35 }
  0xea   : > { %3073 = vmatprep.mubr.msk.f32.mxu1 %vm332_vm8, %v3891_v48  ;;  %3105 = vmatprep.mubr.msk.f32.mxu0 %vm336_vm9, %v3891_v48  ;;  %vm504_vm8 = vcmp.eq.s32.totalorder %v4737_v16, %v4609_v44  ;;  %vm508_vm9 = vcmp.eq.s32.totalorder %v4740_v17, %v4609_v44 }
  0xeb   : > { %3580 = vmatpush1.bf16.msra.mxu0 %v3579_v19  ;;  %v967_v19 = vld [vmem:[%s5695_s1 + $0x978] sm:$0xff] }
  0xec   : > { %3582 = vmatprep.subr.bf16.mxu0 %v3581_v20  ;;  %v3615_v20 = vpack.c.bf16 %v962_v14, %v960_v13  ;;  %v3617_v21 = vpack.c.bf16 %v967_v19, %v965_v15 }
  0xed   : > { %3074 = vmatmul.mubr.msk.f32.gmra.mrb[4].mxu1 %vm331_vm10, %v3891_v48  ;;  %3106 = vmatmul.mubr.msk.f32.gmra.mrb[4].mxu0 %vm335_vm11, %v3891_v48  ;;  %vm503_vm10 = vcmp.eq.s32.totalorder %v4940_v4, %v4609_v44  ;;  %vm507_vm11 = vcmp.eq.s32.totalorder %v4943_v5, %v4609_v44 }
  0xee   : > { %3075 = vmatprep.mubr.msk.f32.mxu1 %vm375_vm12, %v3891_v48  ;;  %3107 = vmatprep.mubr.msk.f32.mxu0 %vm379_vm13, %v3891_v48  ;;  %vm547_vm12 = vcmp.eq.s32.totalorder %v4737_v16, %v4683_v2  ;;  %vm551_vm13 = vcmp.eq.s32.totalorder %v4740_v17, %v4683_v2  ;;  %v3603_v16 = vpack.c.bf16 %v950_v59, %v948_v58 }
  0xef   : > { %3584 = vmatpush1.bf16.msra.mxu0 %v3583_v33  ;;  %v3605_v17 = vpack.c.bf16 %v955_v62, %v953_v61  ;;  %v971_v33 = vld [vmem:[%s5695_s1 + $0x998] sm:$0xff] }
  0xf0   : > { %3586 = vmatprep.subr.bf16.mxu0 %v3585_v27  ;;  %v3619_v27 = vpack.c.bf16 %v966_v24, %v964_v22  ;;  %v3621_v28 = vpack.c.bf16 %v971_v33, %v969_v25 }
  0xf1   : > { %3076 = vmatmul.mubr.msk.f32.gmra.mrb[6].mxu1 %vm374_vm14, %v3891_v48  ;;  %3108 = vmatmul.mubr.msk.f32.gmra.mrb[6].mxu0 %vm378_vm15, %v3891_v48  ;;  %vm546_vm14 = vcmp.eq.s32.totalorder %v4940_v4, %v4683_v2  ;;  %vm550_vm15 = vcmp.eq.s32.totalorder %v4943_v5, %v4683_v2  ;;  %v959_v4 = vld [vmem:[%s5695_s1 + $0x938] sm:$0xff]  ;;  %v3607_v5 = vpack.c.bf16 %v954_v1, %v952_v63 }
  0xf2   : > { %3077 = vmatprep.mubr.msk.f32.mxu1 %vm418_vm0, %v3891_v48  ;;  %3109 = vmatprep.mubr.msk.f32.mxu0 %vm422_vm1, %v3891_v48  ;;  %vm252_vm0 = vcmp.eq.s32.totalorder %v5118_v60, %v4389_v37  ;;  %v3609_v6 = vpack.c.bf16 %v959_v4, %v957_v3 }
  0xf3   : > { %3588 = vmatpush1.bf16.msra.mxu0 %v3587_v32  ;;  %v975_v32 = vld [vmem:[%s5695_s1 + $0x9b8] sm:$0xff] }
  0xf4   : > { %3590 = vmatprep.subr.bf16.mxu0 %v3589_v31  ;;  %v3623_v31 = vpack.c.bf16 %v970_v30, %v968_v29  ;;  %v3625_v34 = vpack.c.bf16 %v975_v32, %v973_v23 }
  0xf5   : > { %3078 = vmatmul.mubr.msk.f32.gmra.mrb[8].mxu1 %vm417_vm2, %v3891_v48  ;;  %3110 = vmatmul.mubr.msk.f32.gmra.mrb[8].mxu0 %vm421_vm3, %v3891_v48  ;;  %vm295_vm2 = vcmp.eq.s32.totalorder %v5118_v60, %v4435_v56 }
  0xf6   : > { %3079 = vmatprep.mubr.msk.f32.mxu1 %vm461_vm4, %v3891_v48  ;;  %3111 = vmatprep.mubr.msk.f32.mxu0 %vm465_vm5, %v3891_v48  ;;  %vm338_vm4 = vcmp.eq.s32.totalorder %v5118_v60, %v4411_v46 }
  0xf7   : > { %3592 = vmatpush1.bf16.msra.mxu0 %v3591_v40  ;;  %v979_v40 = vld [vmem:[%s5695_s1 + $0x9d8] sm:$0xff] }
  0xf8   : > { %3594 = vmatprep.subr.bf16.mxu0 %v3593_v41  ;;  %v3627_v41 = vpack.c.bf16 %v974_v38, %v972_v36  ;;  %v3629_v42 = vpack.c.bf16 %v979_v40, %v977_v39 }
  0xf9   : > { %3080 = vmatmul.mubr.msk.f32.gmra.mrb[10].mxu1 %vm460_vm6, %v3891_v48  ;;  %3112 = vmatmul.mubr.msk.f32.gmra.mrb[10].mxu0 %vm464_vm7, %v3891_v48  ;;  %vm381_vm6 = vcmp.eq.s32.totalorder %v5118_v60, %v4459_v0 }
  0xfa   : > { %3081 = vmatprep.mubr.msk.f32.mxu1 %vm504_vm8, %v3891_v48  ;;  %3113 = vmatprep.mubr.msk.f32.mxu0 %vm508_vm9, %v3891_v48  ;;  %vm424_vm8 = vcmp.eq.s32.totalorder %v5118_v60, %v4533_v18 }
  0xfb   : > { %3596 = vmatpush1.bf16.msra.mxu0 %v3595_v49  ;;  %v983_v49 = vld [vmem:[%s5695_s1 + $0x9f8] sm:$0xff] }
  0xfc   : > { %3598 = vmatprep.subr.bf16.mxu0 %v3597_v50  ;;  %v3631_v50 = vpack.c.bf16 %v978_v45, %v976_v43  ;;  %v3633_v51 = vpack.c.bf16 %v983_v49, %v981_v47 }
  0xfd   : > { %3082 = vmatmul.mubr.msk.f32.gmra.mrb[12].mxu1 %vm503_vm10, %v3891_v48  ;;  %3114 = vmatmul.mubr.msk.f32.gmra.mrb[12].mxu0 %vm507_vm11, %v3891_v48  ;;  %vm467_vm10 = vcmp.eq.s32.totalorder %v5118_v60, %v4583_v35 }
  0xfe   : > { %3083 = vmatprep.mubr.msk.f32.mxu1 %vm547_vm12, %v3891_v48  ;;  %3115 = vmatprep.mubr.msk.f32.mxu0 %vm551_vm13, %v3891_v48  ;;  %vm510_vm12 = vcmp.eq.s32.totalorder %v5118_v60, %v4609_v44 }
  0xff   : > { %3600 = vmatpush1.bf16.msra.mxu0 %v3599_v55  ;;  %v238_v55 = vadd.s32 1024, %v4354_v26 }
 0x100   : > { %3602 = vmatprep.subr.bf16.mxu0 %v3601_v57 }
 0x101   : > { %3084 = vmatmul.mubr.msk.f32.gmra.mrb[14].mxu1 %vm546_vm14, %v3891_v48  ;;  %3116 = vmatmul.mubr.msk.f32.gmra.mrb[14].mxu0 %vm550_vm15, %v3891_v48  ;;  %vm251_vm1 = vcmp.eq.s32.totalorder %v238_v55, %v4389_v37  ;;  %vm294_vm3 = vcmp.eq.s32.totalorder %v238_v55, %v4435_v56  ;;  %vm337_vm5 = vcmp.eq.s32.totalorder %v238_v55, %v4411_v46 }
 0x102   : > { %3117 = vmatprep.mubr.msk.f32.mxu0 %vm252_vm0, %v3891_v48  ;;  %vm380_vm7 = vcmp.eq.s32.totalorder %v238_v55, %v4459_v0  ;;  %vm423_vm9 = vcmp.eq.s32.totalorder %v238_v55, %v4533_v18  ;;  %vm466_vm11 = vcmp.eq.s32.totalorder %v238_v55, %v4583_v35  ;;  %vm509_vm13 = vcmp.eq.s32.totalorder %v238_v55, %v4609_v44 }
 0x103   : > { %3604 = vmatpush1.bf16.msra.mxu0 %v3603_v16  ;;  %vm553_vm14 = vcmp.eq.s32.totalorder %v5118_v60, %v4683_v2  ;;  %vm552_vm15 = vcmp.eq.s32.totalorder %v238_v55, %v4683_v2  ;;  %vm1605_vm0 = vcmask 31744  }
 0x104   : > { %3606 = vmatprep.subr.bf16.mxu0 %v3605_v17 }
 0x107   : > { %3608 = vmatpush1.bf16.msra.mxu0 %v3607_v5 }
 0x108   : > { %3610 = vmatprep.subr.bf16.mxu0 %v3609_v6 }
 0x10b   : > { %3612 = vmatpush1.bf16.msra.mxu0 %v3611_v11 }
 0x10c   : > { %3614 = vmatprep.subr.bf16.mxu0 %v3613_v12 }
 0x10f   : > { %3616 = vmatpush1.bf16.msra.mxu0 %v3615_v20 }
 0x110   : > { %3618 = vmatprep.subr.bf16.mxu0 %v3617_v21 }
 0x113   : > { %3620 = vmatpush1.bf16.msra.mxu0 %v3619_v27 }
 0x114   : > { %3622 = vmatprep.subr.bf16.mxu0 %v3621_v28 }
 0x117   : > { %3624 = vmatpush1.bf16.msra.mxu0 %v3623_v31 }
 0x118   : > { %3626 = vmatprep.subr.bf16.mxu0 %v3625_v34 }
 0x11b   : > { %3628 = vmatpush1.bf16.msra.mxu0 %v3627_v41 }
 0x11c   : > { %3630 = vmatprep.subr.bf16.mxu0 %v3629_v42 }
 0x11f   : > { %3632 = vmatpush1.bf16.msra.mxu0 %v3631_v50 }
 0x120   : > { %3634 = vmatprep.subr.bf16.mxu0 %v3633_v51 }
 0x123   : > { %3636 = vmatpush1.bf16.msra.mxu0 %v3635_v54 }
 0x126   : > { %3118 = vmatmul.mubr.msk.f32.vlgmr.msra.gmra.mrb[0].mxu0 %vm251_vm1, %v3891_v48  ;;  %vm1655_vm1 = vcmask 64512  }
 0x127   : > { %3119 = vmatprep.mubr.msk.f32.mxu0 %vm295_vm2, %v3891_v48  ;;  %vm5306_vm2 = vmpackc.low %vm1655_vm1, %vm1655_vm1 }
 0x12a   : > { %3120 = vmatmul.mubr.msk.f32.gmra.mrb[2].mxu0 %vm294_vm3, %v3891_v48  ;;  %vm1865_vm3 = vcmask 523264  }
 0x12b   : > { %3121 = vmatprep.mubr.msk.f32.mxu0 %vm338_vm4, %v3891_v48  ;;  %vm3901_vm4 = vmmov 0  }
 0x12e   : > { %3122 = vmatmul.mubr.msk.f32.gmra.mrb[4].mxu0 %vm337_vm5, %v3891_v48 }
 0x12f   : > { %3123 = vmatprep.mubr.msk.f32.mxu0 %vm381_vm6, %v3891_v48 }
 0x132   : > { %3124 = vmatmul.mubr.msk.f32.gmra.mrb[6].mxu0 %vm380_vm7, %v3891_v48 }
 0x133   : > { %3125 = vmatprep.mubr.msk.f32.mxu0 %vm424_vm8, %v3891_v48 }
 0x136   : > { %3126 = vmatmul.mubr.msk.f32.gmra.mrb[8].mxu0 %vm423_vm9, %v3891_v48 }
 0x137   : > { %3127 = vmatprep.mubr.msk.f32.mxu0 %vm467_vm10, %v3891_v48 }
 0x13a   : > { %3128 = vmatmul.mubr.msk.f32.gmra.mrb[10].mxu0 %vm466_vm11, %v3891_v48 }
 0x13b   : > { %3129 = vmatprep.mubr.msk.f32.mxu0 %vm510_vm12, %v3891_v48 }
 0x13e   : > { %3130 = vmatmul.mubr.msk.f32.gmra.mrb[12].mxu0 %vm509_vm13, %v3891_v48 }
 0x13f   : > { %3131 = vmatprep.mubr.msk.f32.mxu0 %vm553_vm14, %v3891_v48 }
 0x142   : > { %3132 = vmatmul.mubr.msk.f32.gmra.mrb[14].mxu0 %vm552_vm15, %v3891_v48 }
 0x1b8   : > { %v1163_v26 = vpop.f32.mrb[0].mxu1 }
 0x1b9   : > { %v1165_v37 = vpop.f32.mrb[1].mxu1 }
 0x1bc   : > { %v1169_v46 = vpop.f32.mrb[2].mxu1 }
 0x1bd   : > { %v1171_v56 = vpop.f32.mrb[3].mxu1 }
 0x1c0   : > { %v1175_v0 = vpop.f32.mrb[4].mxu1 }
 0x1c1   : > { %v1177_v18 = vpop.f32.mrb[5].mxu1 }
 0x1c4   : > { %v1181_v35 = vpop.f32.mrb[6].mxu1 }
 0x1c5   : > { %v1183_v57 = vpop.f32.mrb[7].mxu1 }
 0x1c8   : > { %v1187_v44 = vpop.f32.mrb[8].mxu1 }
 0x1c9   : > { %v1189_v58 = vpop.f32.mrb[9].mxu1 }
 0x1cc   : > { %v1193_v59 = vpop.f32.mrb[10].mxu1 }
 0x1cd   : > { %v1195_v61 = vpop.f32.mrb[11].mxu1 }
 0x1d0   : > { %v1199_v62 = vpop.f32.mrb[12].mxu1 }
 0x1d1   : > { %v1201_v60 = vpop.f32.mrb[13].mxu1 }
 0x1d4   : > { %v1205_v16 = vpop.f32.mrb[14].mxu1 }
 0x1d5   : > { %v1207_v17 = vpop.f32.mrb[15].mxu1 }
 0x1f9   : > { %v1502_v63 = vpop.f32.mrb[0].mxu0 }
 0x1fa   : > { %v3685_v2 = vadd.f32 %v1502_v63, %v1163_v26  ;;  %v1504_v48 = vpop.f32.mrb[1].mxu0 }
 0x1fb   : > { %v5265_v1 = vadd.f32 %v1504_v48, %v1165_v37 }
 0x1fc   : > { %v1606_v3 = vsel %vm1605_vm0, %v3685_v2, 0.0  ;;  %v1614_v4 = vsel %vm1605_vm0, 0.0, %v3685_v2 }
 0x1fd   : > { %v1508_v5 = vpop.f32.mrb[2].mxu0  ;;  %3213 = vmatprep.mubr.msk.f32.mxu0 %vm1655_vm1, %v1606_v3  ;;  %3225 = vmatprep.mubr.msk.f32.mxu1 %vm1655_vm1, %v1614_v4 }
 0x1fe   : > { %v3687_v6 = vadd.f32 %v1508_v5, %v1169_v46  ;;  %v1510_v7 = vpop.f32.mrb[3].mxu0 }
 0x1ff   : > { %v3688_v8 = vadd.f32 %v1510_v7, %v1171_v56 }
 0x200   : > { %1550 = vrot.lane.b32.xlu0 %v3687_v6, %s3892_s25 }
 0x201   : > { %v1514_v9 = vpop.f32.mrb[4].mxu0 }
 0x202   : > { %v3689_v10 = vadd.f32 %v1514_v9, %v1175_v0  ;;  %v1516_v11 = vpop.f32.mrb[5].mxu0 }
 0x203   : > { %v3690_v12 = vadd.f32 %v1516_v11, %v1177_v18 }
 0x204   : > { %1554 = vrot.lane.b32.xlu1 %v3689_v10, %s3893_s26 }
 0x205   : > { %v1520_v13 = vpop.f32.mrb[6].mxu0 }
 0x206   : > { %v3691_v14 = vadd.f32 %v1520_v13, %v1181_v35  ;;  %v1522_v15 = vpop.f32.mrb[7].mxu0 }
 0x207   : > { %v3692_v19 = vadd.f32 %v1522_v15, %v1183_v57 }
 0x208   : > { %1558 = vrot.lane.b32.xlu0 %v3691_v14, %s3894_s27 }
 0x209   : > { %v1526_v20 = vpop.f32.mrb[8].mxu0 }
 0x20a   : > { %v3693_v21 = vadd.f32 %v1526_v20, %v1187_v44  ;;  %v1528_v22 = vpop.f32.mrb[9].mxu0  ;;  %v1631_v20 = vld [vmem:[%s5696_s2 + $0x48] sm:$0xff] }
 0x20b   : > { %v5274_v24 = vadd.f32 %v1528_v22, %v1189_v58 }
 0x20c   : > { %1562 = vrot.lane.b32.xlu1 %v3693_v21, %s3895_s28 }
 0x20d   : > { %v1532_v25 = vpop.f32.mrb[10].mxu0 }
 0x20e   : > { %v3695_v33 = vadd.f32 %v1532_v25, %v1193_v59  ;;  %v1534_v27 = vpop.f32.mrb[11].mxu0  ;;  %v1622_v25 = vld [vmem:[%s5696_s2] sm:$0xff] }
 0x20f   : > { %v5277_v28 = vadd.f32 %v1534_v27, %v1195_v61 }
 0x210   : > { %1566 = vrot.lane.b32.xlu0 %v3695_v33, %s3896_s29  ;;  %v1630_v33 = vld [vmem:[%s5696_s2 + $0x40] sm:$0xff] }
 0x211   : > { %v1538_v29 = vpop.f32.mrb[12].mxu0 }
 0x212   : > { %v3697_v30 = vadd.f32 %v1538_v29, %v1199_v62  ;;  %v1540_v23 = vpop.f32.mrb[13].mxu0 }
 0x213   : > { %v5280_v32 = vadd.f32 %v1540_v23, %v1201_v60 }
 0x214   : > { %1570 = vrot.lane.b32.xlu1 %v3697_v30, %s3897_s30 }
 0x215   : > { %v1544_v31 = vpop.f32.mrb[14].mxu0 }
 0x216   : > { %v3699_v34 = vadd.f32 %v1544_v31, %v1205_v16  ;;  %v1546_v36 = vpop.f32.mrb[15].mxu0 }
 0x217   : > { %v5283_v38 = vadd.f32 %v1546_v36, %v1207_v17 }
 0x218   : > { %1574 = vrot.lane.b32.xlu0 %v3699_v34, %s3898_s6 }
 0x272   : > { %v1551_v39 = vpop.permute.xlu0 %1550 }
 0x273   : > { %v3786_v40 = vpack.i.bf16 %v1551_v39, %v3685_v2  ;;  %v1607_v2 = vsel %vm1605_vm0, %v1551_v39, 0.0  ;;  %v1615_v48 = vsel %vm1605_vm0, 0.0, %v1551_v39 }
 0x275   : > { %3787 = vrot.lane.b32.xlu1 %v3786_v40, %s3899_s7  ;;  %v1625_v40 = vld [vmem:[%s5696_s2 + $0x18] sm:$0xff] }
 0x276   : > { %v1555_v41 = vpop.permute.xlu1 %1554 }
 0x277   : > { %v1616_v4 = vsel %vm1605_vm0, 0.0, %v1555_v41 }
 0x27a   : > { %v5286_v42 = vpop.permute.xlu0 %1558 }
 0x27b   : > { %v3791_v43 = vpack.i.bf16 %v5286_v42, %v1555_v41  ;;  %v1609_v6 = vsel %vm1605_vm0, %v5286_v42, 0.0  ;;  %v1617_v7 = vsel %vm1605_vm0, 0.0, %v5286_v42 }
 0x27d   : > { %3792 = vrot.lane.b32.xlu0 %v3791_v43, %s3899_s7  ;;  %v1624_v43 = vld [vmem:[%s5696_s2 + $0x10] sm:$0xff] }
 0x27e   : > { %v5289_v45 = vpop.permute.xlu1 %1562 }
 0x27f   : > { %v1618_v9 = vsel %vm1605_vm0, 0.0, %v5289_v45 }
 0x282   : > { %v5291_v47 = vpop.permute.xlu0 %1566 }
 0x283   : > { %v3796_v49 = vpack.i.bf16 %v5291_v47, %v5289_v45  ;;  %v1611_v10 = vsel %vm1605_vm0, %v5291_v47, 0.0  ;;  %v1619_v11 = vsel %vm1605_vm0, 0.0, %v5291_v47 }
 0x285   : > { %3797 = vrot.lane.b32.xlu1 %v3796_v49, %s3899_s7 }
 0x286   : > { %v5296_v50 = vpop.permute.xlu1 %1570 }
 0x287   : > { %v1620_v13 = vsel %vm1605_vm0, 0.0, %v5296_v50 }
 0x289   : > { %1582 = vrot.lane.b32.xlu1 %v3690_v12, %s3893_s26  ;;  %v1612_v12 = vsel %vm1605_vm0, %v5296_v50, 0.0 }
 0x28a   : > { %v5298_v51 = vpop.permute.xlu0 %1574 }
 0x28b   : > { %v3801_v52 = vpack.i.bf16 %v5298_v51, %v5296_v50  ;;  %v1613_v14 = vsel %vm1605_vm0, %v5298_v51, 0.0  ;;  %v1621_v15 = vsel %vm1605_vm0, 0.0, %v5298_v51 }
 0x28d   : > { %3802 = vrot.lane.b32.xlu0 %v3801_v52, %s3899_s7 }
 0x291   : > { %1578 = vrot.lane.b32.xlu0 %v3688_v8, %s3892_s25  ;;  %v1610_v8 = vsel %vm1605_vm0, %v5289_v45, 0.0 }
 0x295   : > { %1586 = vrot.lane.b32.xlu0 %v3692_v19, %s3894_s27  ;;  %v1623_v19 = vld [vmem:[%s5696_s2 + $0x8] sm:$0xff] }
 0x2e7   : > { %v3788_v53 = vpop.permute.xlu1 %3787 }
 0x2e8   : > { %v3790_v54 = vunpack.i.h.bf16 %v3788_v53  ;;  %v3789_v55 = vunpack.i.l.bf16 %v3788_v53  ;;  %v1633_v53 = vld [vmem:[%s5696_s2 + $0x58] sm:$0xff] }
 0x2ea   : > { %v3637_v37 = vpack.c.bf16 %v3790_v54, %v3789_v55  ;;  %v1632_v54 = vld [vmem:[%s5696_s2 + $0x50] sm:$0xff] }
 0x2ec   : > { %3639 = vmatprep.subr.msk.bf16.mxu0 %vm5306_vm2, %v3637_v37  ;;  %3677 = vmatprep.subr.msk.bf16.mxu1 %vm5306_vm2, %v3637_v37 }
 0x2ed   : > { %3642 = vmatpush3.bf16.xpose.msk.msra.mxu0 %vm5306_vm2, %v3637_v37  ;;  %3681 = vmatpush3.bf16.xpose.msk.msra.mxu1 %vm5306_vm2, %v3637_v37 }
 0x2ef   : > { %v3793_v46 = vpop.permute.xlu0 %3792 }
 0x2f0   : > { %v3795_v56 = vunpack.i.h.bf16 %v3793_v46  ;;  %v3794_v0 = vunpack.i.l.bf16 %v3793_v46 }
 0x2f2   : > { %v3643_v18 = vpack.c.bf16 %v3795_v56, %v3794_v0 }
 0x2f4   : > { %3645 = vmatprep.subr.msk.bf16.mxu0 %vm5306_vm2, %v3643_v18  ;;  %3678 = vmatprep.subr.msk.bf16.mxu1 %vm5306_vm2, %v3643_v18 }
 0x2f5   : > { %3648 = vmatpush3.bf16.xpose.msk.msra.mxu0 %vm5306_vm2, %v3643_v18  ;;  %3682 = vmatpush3.bf16.xpose.msk.msra.mxu1 %vm5306_vm2, %v3643_v18 }
 0x2f7   : > { %v3798_v35 = vpop.permute.xlu1 %3797 }
 0x2f8   : > { %v3800_v57 = vunpack.i.h.bf16 %v3798_v35  ;;  %v3799_v44 = vunpack.i.l.bf16 %v3798_v35 }
 0x2fa   : > { %v3649_v58 = vpack.c.bf16 %v3800_v57, %v3799_v44  ;;  %v1627_v57 = vld [vmem:[%s5696_s2 + $0x28] sm:$0xff]  ;;  %v1626_v44 = vld [vmem:[%s5696_s2 + $0x20] sm:$0xff] }
 0x2fb   : > { %v1583_v3 = vpop.permute.xlu1 %1582 }
 0x2fc   : > { %3651 = vmatprep.subr.msk.bf16.mxu0 %vm5306_vm2, %v3649_v58  ;;  %3679 = vmatprep.subr.msk.bf16.mxu1 %vm5306_vm2, %v3649_v58 }
 0x2fd   : > { %3654 = vmatpush3.bf16.xpose.msk.msra.mxu0 %vm5306_vm2, %v3649_v58  ;;  %3683 = vmatpush3.bf16.xpose.msk.msra.mxu1 %vm5306_vm2, %v3649_v58 }
 0x2ff   : > { %v3803_v59 = vpop.permute.xlu0 %3802 }
 0x300   : > { %v3805_v61 = vunpack.i.h.bf16 %v3803_v59  ;;  %v3804_v62 = vunpack.i.l.bf16 %v3803_v59 }
 0x302   : > { %v3655_v60 = vpack.c.bf16 %v3805_v61, %v3804_v62 }
 0x303   : > { %v1579_v16 = vpop.permute.xlu0 %1578 }
 0x304   : > { %v3661_v17 = vpack.c.bf16 %v1579_v16, %v5265_v1  ;;  %3657 = vmatprep.subr.msk.bf16.mxu0 %vm5306_vm2, %v3655_v60  ;;  %3680 = vmatprep.subr.msk.bf16.mxu1 %vm5306_vm2, %v3655_v60  ;;  %v1608_v1 = vsel %vm1605_vm0, %v1555_v41, 0.0 }
 0x305   : > { %3660 = vmatpush3.bf16.xpose.msk.msra.mxu0 %vm5306_vm2, %v3655_v60  ;;  %3684 = vmatpush3.bf16.xpose.msk.msra.mxu1 %vm5306_vm2, %v3655_v60 }
 0x306   : > { %3662 = vmatprep.subr.bf16.mxu1 %v3661_v17 }
 0x307   : > { %v1587_v63 = vpop.permute.xlu0 %1586 }
 0x308   : > { %v3665_v5 = vpack.c.bf16 %v1587_v63, %v1583_v3 }
 0x30c   : > { %3214 = vmatmul.mubr.msk.f32.vlgmr.msra.gmra.mrb[16].mxu0 %vm1655_vm1, %v1607_v2  ;;  %3226 = vmatmul.mubr.msk.f32.vlgmr.msra.gmra.mrb[16].mxu1 %vm1655_vm1, %v1615_v48  ;;  %v1635_v2 = vld [vmem:[%s5696_s2 + $0x68] sm:$0xff]  ;;  %v1634_v48 = vld [vmem:[%s5696_s2 + $0x60] sm:$0xff] }
 0x30d   : > { %3216 = vmatprep.mubr.msk.f32.mxu0 %vm1655_vm1, %v1608_v1  ;;  %3228 = vmatprep.mubr.msk.f32.mxu1 %vm1655_vm1, %v1616_v4 }
 0x30e   : > { %3664 = vmatpush3.bf16.msra.mxu1 %v3661_v17 }
 0x30f   : > { %3666 = vmatprep.subr.bf16.mxu1 %v3665_v5 }
 0x310   : > { %3217 = vmatmul.mubr.msk.f32.gmra.mrb[18].mxu0 %vm1655_vm1, %v1609_v6  ;;  %3229 = vmatmul.mubr.msk.f32.gmra.mrb[18].mxu1 %vm1655_vm1, %v1617_v7  ;;  %v1629_v6 = vld [vmem:[%s5696_s2 + $0x38] sm:$0xff]  ;;  %v1628_v7 = vld [vmem:[%s5696_s2 + $0x30] sm:$0xff] }
 0x311   : > { %3219 = vmatprep.mubr.msk.f32.mxu0 %vm1655_vm1, %v1610_v8  ;;  %3231 = vmatprep.mubr.msk.f32.mxu1 %vm1655_vm1, %v1618_v9 }
 0x312   : > { %3668 = vmatpush3.bf16.msra.mxu1 %v3665_v5 }
 0x314   : > { %3220 = vmatmul.mubr.msk.f32.gmra.mrb[20].mxu0 %vm1655_vm1, %v1611_v10  ;;  %3232 = vmatmul.mubr.msk.f32.gmra.mrb[20].mxu1 %vm1655_vm1, %v1619_v11 }
 0x315   : > { %3222 = vmatprep.mubr.msk.f32.mxu0 %vm1655_vm1, %v1612_v12  ;;  %3234 = vmatprep.mubr.msk.f32.mxu1 %vm1655_vm1, %v1620_v13  ;;  %v1637_v12 = vld [vmem:[%s5696_s2 + $0x78] sm:$0xff]  ;;  %v1636_v13 = vld [vmem:[%s5696_s2 + $0x70] sm:$0xff] }
 0x318   : > { %3223 = vmatmul.mubr.msk.f32.gmra.mrb[22].mxu0 %vm1655_vm1, %v1613_v14  ;;  %3235 = vmatmul.mubr.msk.f32.gmra.mrb[22].mxu1 %vm1655_vm1, %v1621_v15 }
 0x3df   : > { %v3215_v21 = vpop.f32.mrb[16].mxu0  ;;  %v3227_v22 = vpop.f32.mrb[16].mxu1 }
 0x3e0   : > { %v5393_v27 = vadd.f32 %v3215_v21, %v1623_v19  ;;  %v5395_v29 = vadd.f32 %v3227_v22, %v1631_v20  ;;  %v1786_v30 = vpop.f32.mrb[17].mxu0  ;;  %v1826_v23 = vpop.f32.mrb[17].mxu1 }
 0x3e1   : > { %v5397_v31 = vadd.f32 %v1786_v30, %v1622_v25  ;;  %v5399_v34 = vadd.f32 %v1826_v23, %v1630_v33 }
 0x3e2   : > { %v1869_v36 = vsel %vm1865_vm3, %v5393_v27, -inf  ;;  %v1893_v39 = vsel %vm1865_vm3, %v5395_v29, -inf }
 0x3e3   : > { %1870 = vmax.xlane.f32.xlu0 %v1869_v36  ;;  %v3218_v41 = vpop.f32.mrb[18].mxu0  ;;  %1894 = vmax.xlane.f32.xlu1 %v1893_v39  ;;  %v3230_v42 = vpop.f32.mrb[18].mxu1  ;;  %v1866_v51 = vsel %vm1865_vm3, %v5397_v31, -inf  ;;  %v1890_v52 = vsel %vm1865_vm3, %v5399_v34, -inf }
 0x3e4   : > { %v1796_v45 = vpop.f32.mrb[19].mxu0  ;;  %v1836_v47 = vpop.f32.mrb[19].mxu1  ;;  %v5411_v49 = vadd.f32 %v3218_v41, %v1625_v40  ;;  %v5425_v56 = vadd.f32 %v3230_v42, %v1633_v53 }
 0x3e5   : > { %v5413_v50 = vadd.f32 %v1796_v45, %v1624_v43  ;;  %v5427_v0 = vadd.f32 %v1836_v47, %v1632_v54 }
 0x3e6   : > { %v1875_v18 = vsel %vm1865_vm3, %v5411_v49, -inf  ;;  %v1899_v17 = vsel %vm1865_vm3, %v5425_v56, -inf }
 0x3e7   : > { %v3221_v55 = vpop.f32.mrb[20].mxu0  ;;  %1867 = vmax.xlane.f32.xlu1 %v1866_v51  ;;  %v3233_v26 = vpop.f32.mrb[20].mxu1  ;;  %1891 = vmax.xlane.f32.xlu0 %v1890_v52  ;;  %v1872_v35 = vsel %vm1865_vm3, %v5413_v50, -inf  ;;  %v1896_v63 = vsel %vm1865_vm3, %v5427_v0, -inf }
 0x3e8   : > { %v1806_v37 = vpop.f32.mrb[21].mxu0  ;;  %v1846_v46 = vpop.f32.mrb[21].mxu1  ;;  %v5439_v60 = vadd.f32 %v3221_v55, %v1627_v57  ;;  %v5453_v3 = vadd.f32 %v3233_v26, %v1635_v2 }
 0x3e9   : > { %v5441_v16 = vadd.f32 %v1806_v37, %v1626_v44  ;;  %v5455_v1 = vadd.f32 %v1846_v46, %v1634_v48 }
 0x3ea   : > { %v1881_v4 = vsel %vm1865_vm3, %v5439_v60, -inf  ;;  %v1905_v10 = vsel %vm1865_vm3, %v5453_v3, -inf }
 0x3eb   : > { %v3224_v58 = vpop.f32.mrb[22].mxu0  ;;  %1876 = vmax.xlane.f32.xlu1 %v1875_v18  ;;  %v3236_v59 = vpop.f32.mrb[22].mxu1  ;;  %1873 = vmax.xlane.f32.xlu0 %v1872_v35  ;;  %v1878_v5 = vsel %vm1865_vm3, %v5441_v16, -inf  ;;  %v1902_v11 = vsel %vm1865_vm3, %v5455_v1, -inf }
 0x3ec   : > { %v1816_v61 = vpop.f32.mrb[23].mxu0  ;;  %v1856_v62 = vpop.f32.mrb[23].mxu1  ;;  %v5467_v8 = vadd.f32 %v3224_v58, %v1629_v6  ;;  %v5481_v14 = vadd.f32 %v3236_v59, %v1637_v12 }
 0x3ed   : > { %v5469_v9 = vadd.f32 %v1816_v61, %v1628_v7  ;;  %v5483_v15 = vadd.f32 %v1856_v62, %v1636_v13 }
 0x3ee   : > { %v1887_v19 = vsel %vm1865_vm3, %v5467_v8, -inf  ;;  %v1911_v21 = vsel %vm1865_vm3, %v5481_v14, -inf }
 0x3ef   : > { %1900 = vmax.xlane.f32.xlu1 %v1899_v17  ;;  %1897 = vmax.xlane.f32.xlu0 %v1896_v63  ;;  %v1884_v20 = vsel %vm1865_vm3, %v5469_v9, -inf  ;;  %v1908_v22 = vsel %vm1865_vm3, %v5483_v15, -inf }
 0x3f3   : > { %1882 = vmax.xlane.f32.xlu1 %v1881_v4  ;;  %1879 = vmax.xlane.f32.xlu0 %v1878_v5 }
 0x3f7   : > { %1906 = vmax.xlane.f32.xlu1 %v1905_v10  ;;  %1903 = vmax.xlane.f32.xlu0 %v1902_v11 }
 0x3fb   : > { %1888 = vmax.xlane.f32.xlu1 %v1887_v19  ;;  %1885 = vmax.xlane.f32.xlu0 %v1884_v20 }
 0x3ff   : > { %1912 = vmax.xlane.f32.xlu1 %v1911_v21  ;;  %1909 = vmax.xlane.f32.xlu0 %v1908_v22 }
 0x410   : > { %1594 = vrot.lane.b32.xlu1 %v5277_v28, %s3896_s29 }
 0x415   : > { %1590 = vrot.lane.b32.xlu0 %v5274_v24, %s3895_s28 }
 0x470   : > { %v1871_v25 = vpop.xlane.xlu0 %1870  ;;  %v1895_v33 = vpop.xlane.xlu1 %1894 }
 0x471   : > { %v1915_v30 = vsub.f32 %v5393_v27, %v1871_v25  ;;  %v1923_v23 = vsub.f32 %v5395_v29, %v1895_v33 }
 0x473   : > { %v1932_v36 = vmul.f32 1.442695, %v1915_v30  ;;  %v1948_v39 = vmul.f32 1.442695, %v1923_v23 }
 0x474   : > { %v1868_v40 = vpop.xlane.xlu1 %1867  ;;  %v1892_v41 = vpop.xlane.xlu0 %1891 }
 0x475   : > { %3807 = vpow2.f32 %v1932_v36  ;;  %v1914_v42 = vsub.f32 %v5397_v31, %v1868_v40  ;;  %v1922_v43 = vsub.f32 %v5399_v34, %v1892_v41 }
 0x476   : > { %3809 = vpow2.f32 %v1948_v39 }
 0x477   : > { %v1930_v28 = vmul.f32 1.442695, %v1914_v42  ;;  %v1946_v45 = vmul.f32 1.442695, %v1922_v43 }
 0x478   : > { %v1877_v47 = vpop.xlane.xlu1 %1876  ;;  %v1874_v24 = vpop.xlane.xlu0 %1873 }
 0x479   : > { %3811 = vpow2.f32 %v1930_v28  ;;  %v1917_v51 = vsub.f32 %v5411_v49, %v1877_v47  ;;  %v1916_v27 = vsub.f32 %v5413_v50, %v1874_v24 }
 0x47a   : > { %3813 = vpow2.f32 %v1946_v45 }
 0x47b   : > { %v1936_v29 = vmul.f32 1.442695, %v1917_v51  ;;  %v1934_v52 = vmul.f32 1.442695, %v1916_v27 }
 0x47c   : > { %v5503_v53 = vpop.xlane.xlu1 %1900  ;;  %v1898_v54 = vpop.xlane.xlu0 %1897 }
 0x47d   : > { %3815 = vpow2.f32 %v1936_v29  ;;  %v1924_v23 = vsub.f32 %v5427_v0, %v1898_v54  ;;  %v1925_v42 = vsub.f32 %v5425_v56, %v5503_v53 }
 0x47e   : > { %3817 = vpow2.f32 %v1934_v52 }
 0x47f   : > { %v5505_v31 = vpop.eup %3807  ;;  %v1950_v36 = vmul.f32 1.442695, %v1924_v23 }
 0x480   : > { %v1883_v34 = vpop.xlane.xlu1 %1882  ;;  %v1880_v55 = vpop.xlane.xlu0 %1879  ;;  %v1965_v26 = vsel %vm1865_vm3, %v5505_v31, 0.0 }
 0x481   : > { %v5509_v37 = vpop.eup %3809  ;;  %v1919_v49 = vsub.f32 %v5439_v60, %v1883_v34  ;;  %v1918_v50 = vsub.f32 %v5441_v16, %v1880_v55  ;;  %1966 = vadd.xlane.f32.xlu1 %v1965_v26 }
 0x482   : > { %v1989_v58 = vsel %vm1865_vm3, %v5509_v37, 0.0 }
 0x483   : > { %v5513_v46 = vpop.eup %3811  ;;  %v1940_v18 = vmul.f32 1.442695, %v1919_v49  ;;  %v1938_v35 = vmul.f32 1.442695, %v1918_v50 }
 0x484   : > { %v1907_v57 = vpop.xlane.xlu1 %1906  ;;  %v1904_v44 = vpop.xlane.xlu0 %1903  ;;  %v1962_v59 = vsel %vm1865_vm3, %v5513_v46, 0.0 }
 0x485   : > { %v5519_v61 = vpop.eup %3813  ;;  %3819 = vpow2.f32 %v1940_v18  ;;  %1990 = vadd.xlane.f32.xlu1 %v1989_v58  ;;  %1963 = vadd.xlane.f32.xlu0 %v1962_v59  ;;  %v1926_v39 = vsub.f32 %v5455_v1, %v1904_v44  ;;  %v1927_v40 = vsub.f32 %v5453_v3, %v1907_v57 }
 0x486   : > { %3821 = vpow2.f32 %v1938_v35  ;;  %v1986_v63 = vsel %vm1865_vm3, %v5519_v61, 0.0 }
 0x487   : > { %v5521_v62 = vpop.eup %3815  ;;  %v1954_v41 = vmul.f32 1.442695, %v1926_v39  ;;  %v1956_v43 = vmul.f32 1.442695, %v1927_v40 }
 0x488   : > { %v1889_v60 = vpop.xlane.xlu1 %1888  ;;  %v1886_v16 = vpop.xlane.xlu0 %1885  ;;  %v1971_v17 = vsel %vm1865_vm3, %v5521_v62, 0.0 }
 0x489   : > { %v5527_v2 = vpop.eup %3817  ;;  %v1921_v48 = vsub.f32 %v5467_v8, %v1889_v60  ;;  %v1920_v4 = vsub.f32 %v5469_v9, %v1886_v16  ;;  %1972 = vadd.xlane.f32.xlu1 %v1971_v17  ;;  %1987 = vadd.xlane.f32.xlu0 %v1986_v63 }
 0x48a   : > { %v1968_v11 = vsel %vm1865_vm3, %v5527_v2, 0.0 }
 0x48b   : > { %v1944_v5 = vmul.f32 1.442695, %v1921_v48  ;;  %v1942_v6 = vmul.f32 1.442695, %v1920_v4 }
 0x48c   : > { %v1913_v7 = vpop.xlane.xlu1 %1912  ;;  %v1910_v10 = vpop.xlane.xlu0 %1909 }
 0x48d   : > { %3823 = vpow2.f32 %v1944_v5  ;;  %1969 = vadd.xlane.f32.xlu0 %v1968_v11  ;;  %v1929_v28 = vsub.f32 %v5481_v14, %v1913_v7  ;;  %v1928_v45 = vsub.f32 %v5483_v15, %v1910_v10 }
 0x48e   : > { %3825 = vpow2.f32 %v1942_v6 }
 0x48f   : > { %v5533_v12 = vpop.eup %3819  ;;  %3827 = vpow2.f32 %v1950_v36  ;;  %v1958_v1 = vmul.f32 1.442695, %v1928_v45 }
 0x490   : > { %v5535_v13 = vpop.eup %3821  ;;  %v1595_v19 = vpop.permute.xlu1 %1594  ;;  %v1977_v9 = vsel %vm1865_vm3, %v5533_v12, 0.0  ;;  %3829 = vpow2.f32 %v1954_v41 }
 0x491   : > { %v1591_v8 = vpop.permute.xlu0 %1590  ;;  %1978 = vadd.xlane.f32.xlu1 %v1977_v9  ;;  %v1974_v21 = vsel %vm1865_vm3, %v5535_v13, 0.0  ;;  %3831 = vpow2.f32 %v1956_v43 }
 0x492   : > { %v3669_v20 = vpack.c.bf16 %v1595_v19, %v1591_v8  ;;  %1975 = vadd.xlane.f32.xlu0 %v1974_v21 }
 0x494   : > { %3670 = vmatprep.subr.bf16.mxu1 %v3669_v20 }
 0x495   : > { %3672 = vmatpush3.bf16.msra.mxu1 %v3669_v20 }
 0x497   : > { %v5541_v22 = vpop.eup %3823 }
 0x498   : > { %v1983_v25 = vsel %vm1865_vm3, %v5541_v22, 0.0  ;;  %v5545_v33 = vpop.eup %3825 }
 0x499   : > { %1984 = vadd.xlane.f32.xlu1 %v1983_v25  ;;  %v1980_v30 = vsel %vm1865_vm3, %v5545_v33, 0.0  ;;  %v5560_v0 = vpop.eup %3827 }
 0x49a   : > { %v1992_v3 = vsel %vm1865_vm3, %v5560_v0, 0.0  ;;  %v5564_v47 = vpop.eup %3829 }
 0x49b   : > { %v1998_v56 = vsel %vm1865_vm3, %v5564_v47, 0.0  ;;  %v5568_v14 = vpop.eup %3831 }
 0x49c   : > { %v2001_v24 = vsel %vm1865_vm3, %v5568_v14, 0.0 }
 0x49d   : > { %1981 = vadd.xlane.f32.xlu1 %v1980_v30 }
 0x4a8   : > { %1598 = vrot.lane.b32.xlu0 %v5280_v32, %s3897_s30  ;;  %v1952_v32 = vmul.f32 1.442695, %v1925_v42 }
 0x4aa   : > { %3833 = vpow2.f32 %v1952_v32 }
 0x4ae   : > { %1602 = vrot.lane.b32.xlu1 %v5283_v38, %s3898_s6  ;;  %v1960_v38 = vmul.f32 1.442695, %v1929_v28 }
 0x4b0   : > { %3835 = vpow2.f32 %v1960_v38 }
 0x4b1   : > { %3837 = vpow2.f32 %v1958_v1  ;;  %v2244_v1 = vld [vmem:[%s5697_s3 + $0x8] sm:$0xff] }
 0x4b4   : > { %v5570_v15 = vpop.eup %3833 }
 0x4b5   : > { %v1995_v27 = vsel %vm1865_vm3, %v5570_v15, 0.0 }
 0x4ba   : > { %v5574_v51 = vpop.eup %3835 }
 0x4bb   : > { %v5578_v29 = vpop.eup %3837  ;;  %v2007_v52 = vsel %vm1865_vm3, %v5574_v51, 0.0 }
 0x4bc   : > { %v2004_v53 = vsel %vm1865_vm3, %v5578_v29, 0.0 }
 0x4c7   : > { %1993 = vadd.xlane.f32.xlu0 %v1992_v3 }
 0x4cb   : > { %1999 = vadd.xlane.f32.xlu0 %v1998_v56 }
 0x4cf   : > { %2002 = vadd.xlane.f32.xlu0 %v2001_v24 }
 0x4d2   : > { %1996 = vadd.xlane.f32.xlu1 %v1995_v27 }
 0x4d3   : > { %2008 = vadd.xlane.f32.xlu0 %v2007_v52  ;;  %v2243_v52 = vld [vmem:[%s5697_s3] sm:$0xff] }
 0x4d6   : > { %2005 = vadd.xlane.f32.xlu1 %v2004_v53 }
 0x50e   : > { %v1967_v54 = vpop.xlane.xlu1 %1966 }
 0x512   : > { %v1964_v34 = vpop.xlane.xlu0 %1963  ;;  %v1991_v55 = vpop.xlane.xlu1 %1990 }
 0x513   : > { %3839 = vrcp.f32 %v1964_v34 }
 0x514   : > { %3841 = vrcp.f32 %v1967_v54 }
 0x516   : > { %v1988_v26 = vpop.xlane.xlu0 %1987  ;;  %v1973_v50 = vpop.xlane.xlu1 %1972 }
 0x51a   : > { %v1970_v35 = vpop.xlane.xlu0 %1969 }
 0x51b   : > { %3843 = vrcp.f32 %v1970_v35 }
 0x51c   : > { %3845 = vrcp.f32 %v1973_v50 }
 0x51d   : > { %v3840_v49 = vpop.eup %3839 }
 0x51e   : > { %v2026_v18 = vmul.f32 %v3840_v49, %v5513_v46  ;;  %v1979_v57 = vpop.xlane.xlu1 %1978  ;;  %v3842_v63 = vpop.eup %3841 }
 0x51f   : > { %v1976_v58 = vpop.xlane.xlu0 %1975  ;;  %v2027_v46 = vmul.f32 %v3842_v63, %v5505_v31 }
 0x520   : > { %3253 = vmatprep.mubr.msk.f32.mxu1 %vm1865_vm3, %v2026_v18  ;;  %3847 = vrcp.f32 %v1976_v58  ;;  %v2466_v18 = vld [vmem:[%s5697_s3 + $0x18] sm:$0xff] }
 0x521   : > { %3849 = vrcp.f32 %v1979_v57 }
 0x523   : > { %v1599_v60 = vpop.permute.xlu0 %1598 }
 0x525   : > { %v3844_v48 = vpop.eup %3843 }
 0x526   : > { %v1985_v44 = vpop.xlane.xlu1 %1984  ;;  %v3846_v4 = vpop.eup %3845  ;;  %v2028_v5 = vmul.f32 %v3844_v48, %v5527_v2  ;;  %v2616_v48 = vld [vmem:[%s5697_s3 + $0x28] sm:$0xff] }
 0x527   : > { %v2029_v7 = vmul.f32 %v3846_v4, %v5521_v62  ;;  %v2691_v4 = vld [vmem:[%s5697_s3 + $0x30] sm:$0xff] }
 0x52a   : > { %v1982_v59 = vpop.xlane.xlu1 %1981  ;;  %v3848_v6 = vpop.eup %3847 }
 0x52b   : > { %3851 = vrcp.f32 %v1982_v59  ;;  %v3850_v10 = vpop.eup %3849  ;;  %v2030_v11 = vmul.f32 %v3848_v6, %v5535_v13  ;;  %v2541_v59 = vld [vmem:[%s5697_s3 + $0x20] sm:$0xff] }
 0x52c   : > { %3853 = vrcp.f32 %v1985_v44  ;;  %v2031_v31 = vmul.f32 %v3850_v10, %v5533_v12 }
 0x52d   : > { %3855 = vrcp.f32 %v1988_v26 }
 0x52e   : > { %v1603_v16 = vpop.permute.xlu1 %1602  ;;  %3857 = vrcp.f32 %v1991_v55  ;;  %v2391_v55 = vld [vmem:[%s5697_s3 + $0x10] sm:$0xff] }
 0x52f   : > { %v3673_v17 = vpack.c.bf16 %v1603_v16, %v1599_v60 }
 0x531   : > { %3674 = vmatprep.subr.bf16.mxu1 %v3673_v17 }
 0x532   : > { %3676 = vmatpush3.bf16.msra.mxu1 %v3673_v17 }
 0x535   : > { %3254 = vmatmul.mubr.msk.f32.vlgmr.msra.gmra.mrb[24].mxu1 %vm1865_vm3, %v2027_v46  ;;  %v3852_v19 = vpop.eup %3851 }
 0x536   : > { %3256 = vmatprep.mubr.msk.f32.mxu1 %vm1865_vm3, %v2028_v5  ;;  %v3854_v8 = vpop.eup %3853  ;;  %v2032_v2 = vmul.f32 %v3852_v19, %v5545_v33  ;;  %v2766_v5 = vld [vmem:[%s5697_s3 + $0x38] sm:$0xff] }
 0x537   : > { %v3856_v9 = vpop.eup %3855  ;;  %v2033_v62 = vmul.f32 %v3854_v8, %v5541_v22 }
 0x538   : > { %v3858_v20 = vpop.eup %3857  ;;  %v2034_v13 = vmul.f32 %v3856_v9, %v5519_v61 }
 0x539   : > { %3257 = vmatmul.mubr.msk.f32.gmra.mrb[26].mxu1 %vm1865_vm3, %v2029_v7  ;;  %v2035_v21 = vmul.f32 %v3858_v20, %v5509_v37 }
 0x53a   : > { %3259 = vmatprep.mubr.msk.f32.mxu1 %vm1865_vm3, %v2030_v11 }
 0x53d   : > { %3260 = vmatmul.mubr.msk.f32.gmra.mrb[28].mxu1 %vm1865_vm3, %v2031_v31 }
 0x53e   : > { %3262 = vmatprep.mubr.msk.f32.mxu1 %vm1865_vm3, %v2032_v2 }
 0x541   : > { %3263 = vmatmul.mubr.msk.f32.gmra.mrb[30].mxu1 %vm1865_vm3, %v2033_v62 }
 0x542   : > { %3265 = vmatprep.mubr.msk.f32.mxu1 %vm1865_vm3, %v2034_v13 }
 0x545   : > { %3266 = vmatmul.mubr.msk.f32.gmra.mrb[32].mxu1 %vm1865_vm3, %v2035_v21 }
 0x554   : > { %v1994_v12 = vpop.xlane.xlu0 %1993 }
 0x555   : > { %3859 = vrcp.f32 %v1994_v12 }
 0x558   : > { %v2000_v25 = vpop.xlane.xlu0 %1999 }
 0x559   : > { %3861 = vrcp.f32 %v2000_v25 }
 0x55c   : > { %v2003_v33 = vpop.xlane.xlu0 %2002 }
 0x55f   : > { %v3860_v30 = vpop.eup %3859  ;;  %v1997_v23 = vpop.xlane.xlu1 %1996 }
 0x560   : > { %3863 = vrcp.f32 %v1997_v23  ;;  %v2036_v22 = vmul.f32 %v3860_v30, %v5560_v0  ;;  %v2009_v61 = vpop.xlane.xlu0 %2008  ;;  %v3900_v0 = vmov 0.0  }
 0x561   : > { %3865 = vrcp.f32 %v2003_v33  ;;  %3277 = vmatprep.subr.mxu1 %v3900_v0 }
 0x562   : > { %3268 = vmatprep.mubr.msk.f32.mxu1 %vm1865_vm3, %v2036_v22  ;;  %3278 = vmatpush3.msra.mxu1 %v2244_v1 }
 0x563   : > { %v2006_v36 = vpop.xlane.xlu1 %2005  ;;  %v3862_v37 = vpop.eup %3861  ;;  %3282 = vmatprep.subr.mxu1 %v3900_v0 }
 0x564   : > { %3867 = vrcp.f32 %v2006_v36  ;;  %v2038_v42 = vmul.f32 %v3862_v37, %v5564_v47  ;;  %v3050_v37 = vld [vmem:[%s5698_s4] ss:$0 sm:$0xff] }
 0x565   : > { %3869 = vrcp.f32 %v2009_v61 }
 0x56a   : > { %v3864_v39 = vpop.eup %3863 }
 0x56b   : > { %v2037_v40 = vmul.f32 %v3864_v39, %v5570_v15  ;;  %v3866_v41 = vpop.eup %3865 }
 0x56c   : > { %v2039_v28 = vmul.f32 %v3866_v41, %v5568_v14 }
 0x56d   : > { %3269 = vmatmul.mubr.msk.f32.gmra.mrb[34].mxu1 %vm1865_vm3, %v2037_v40 }
 0x56e   : > { %v3868_v43 = vpop.eup %3867  ;;  %3271 = vmatprep.mubr.msk.f32.mxu1 %vm1865_vm3, %v2038_v42 }
 0x56f   : > { %v2040_v32 = vmul.f32 %v3868_v43, %v5578_v29  ;;  %v3870_v45 = vpop.eup %3869 }
 0x570   : > { %v2041_v38 = vmul.f32 %v3870_v45, %v5574_v51 }
 0x571   : > { %3272 = vmatmul.mubr.msk.f32.gmra.mrb[36].mxu1 %vm1865_vm3, %v2039_v28 }
 0x572   : > { %3274 = vmatprep.mubr.msk.f32.mxu1 %vm1865_vm3, %v2040_v32 }
 0x575   : > { %3275 = vmatmul.mubr.msk.f32.gmra.mrb[38].mxu1 %vm1865_vm3, %v2041_v38 }
 0x576   : > { %3279 = vmatprep.mubr.msk.f32.mxu1 %vm3901_vm4, %v3900_v0 }
 0x608   : > { %v3255_v3 = vpop.f32.mrb[24].mxu1 }
 0x609   : > { %v2156_v47 = vpop.f32.mrb[25].mxu1 }
 0x60c   : > { %v3258_v56 = vpop.f32.mrb[26].mxu1 }
 0x60d   : > { %v2166_v14 = vpop.f32.mrb[27].mxu1 }
 0x610   : > { %v3261_v15 = vpop.f32.mrb[28].mxu1 }
 0x611   : > { %v2176_v24 = vpop.f32.mrb[29].mxu1 }
 0x614   : > { %v3264_v51 = vpop.f32.mrb[30].mxu1 }
 0x615   : > { %v2186_v27 = vpop.f32.mrb[31].mxu1 }
 0x618   : > { %v3267_v29 = vpop.f32.mrb[32].mxu1 }
 0x619   : > { %v2236_v53 = vsel %vm1605_vm0, %v3255_v3, %v3267_v29  ;;  %v2196_v54 = vpop.f32.mrb[33].mxu1 }
 0x61a   : > { %v2235_v34 = vsel %vm1605_vm0, %v2156_v47, %v2196_v54  ;;  %3280 = vmatmul.mubr.msk.f32.vlgmr.msra.gmra.mrb[40].mxu1 %vm1655_vm1, %v2236_v53 }
 0x61b   : > { %3283 = vmatpush3.msra.mxu1 %v2243_v52  ;;  %3284 = vmatprep.mubr.msk.f32.mxu1 %vm3901_vm4, %v3900_v0 }
 0x61c   : > { %3287 = vmatprep.subr.mxu1 %v3900_v0 }
 0x61e   : > { %3285 = vmatmul.mubr.msk.f32.vlgmr.msra.gmra.mrb[42].mxu1 %vm1655_vm1, %v2235_v34 }
 0x61f   : > { %3288 = vmatpush3.msra.mxu1 %v2391_v55  ;;  %3289 = vmatprep.mubr.msk.f32.mxu1 %vm3901_vm4, %v3900_v0 }
 0x620   : > { %3292 = vmatprep.subr.mxu1 %v3900_v0 }
 0x640   : > { %v3270_v26 = vpop.f32.mrb[34].mxu1 }
 0x641   : > { %v2238_v49 = vsel %vm1605_vm0, %v3258_v56, %v3270_v26  ;;  %v2206_v50 = vpop.f32.mrb[35].mxu1 }
 0x642   : > { %v2237_v35 = vsel %vm1605_vm0, %v2166_v14, %v2206_v50 }
 0x643   : > { %3290 = vmatmul.mubr.msk.f32.vlgmr.msra.gmra.mrb[44].mxu1 %vm1655_vm1, %v2237_v35 }
 0x644   : > { %v3273_v57 = vpop.f32.mrb[36].mxu1  ;;  %3293 = vmatpush3.msra.mxu1 %v2466_v18  ;;  %3294 = vmatprep.mubr.msk.f32.mxu1 %vm3901_vm4, %v3900_v0 }
 0x645   : > { %v2240_v44 = vsel %vm1605_vm0, %v3261_v15, %v3273_v57  ;;  %v2216_v58 = vpop.f32.mrb[37].mxu1  ;;  %3297 = vmatprep.subr.mxu1 %v3900_v0 }
 0x646   : > { %v2239_v60 = vsel %vm1605_vm0, %v2176_v24, %v2216_v58 }
 0x647   : > { %3295 = vmatmul.mubr.msk.f32.vlgmr.msra.gmra.mrb[46].mxu1 %vm1655_vm1, %v2238_v49 }
 0x648   : > { %v3276_v16 = vpop.f32.mrb[38].mxu1  ;;  %3298 = vmatpush3.msra.mxu1 %v2541_v59  ;;  %3299 = vmatprep.mubr.msk.f32.mxu1 %vm3901_vm4, %v3900_v0 }
 0x649   : > { %v2242_v17 = vsel %vm1605_vm0, %v3264_v51, %v3276_v16  ;;  %v2226_v63 = vpop.f32.mrb[39].mxu1  ;;  %3302 = vmatprep.subr.mxu1 %v3900_v0 }
 0x64a   : > { %v2241_v46 = vsel %vm1605_vm0, %v2186_v27, %v2226_v63 }
 0x64b   : > { %3300 = vmatmul.mubr.msk.f32.vlgmr.msra.gmra.mrb[48].mxu1 %vm1655_vm1, %v2239_v60 }
 0x64c   : > { %3303 = vmatpush3.msra.mxu1 %v2616_v48  ;;  %3304 = vmatprep.mubr.msk.f32.mxu1 %vm3901_vm4, %v3900_v0 }
 0x64d   : > { %3307 = vmatprep.subr.mxu1 %v3900_v0 }
 0x64f   : > { %3305 = vmatmul.mubr.msk.f32.vlgmr.msra.gmra.mrb[50].mxu1 %vm1655_vm1, %v2240_v44 }
 0x650   : > { %3308 = vmatpush3.msra.mxu1 %v2691_v4  ;;  %3309 = vmatprep.mubr.msk.f32.mxu1 %vm3901_vm4, %v3900_v0 }
 0x651   : > { %3312 = vmatprep.subr.mxu1 %v3900_v0 }
 0x653   : > { %3310 = vmatmul.mubr.msk.f32.vlgmr.msra.gmra.mrb[52].mxu1 %vm1655_vm1, %v2241_v46 }
 0x654   : > { %3313 = vmatpush3.msra.mxu1 %v2766_v5  ;;  %3314 = vmatprep.mubr.msk.f32.mxu1 %vm3901_vm4, %v3900_v0 }
 0x657   : > { %3315 = vmatmul.mubr.msk.f32.vlgmr.msra.gmra.mrb[54].mxu1 %vm1655_vm1, %v2242_v17 }
 0x6ed   : > { %v2314_v6 = vpop.f32.mrb[40].mxu1 }
 0x6ee   : > { %v3281_v7 = vpop.f32.mrb[41].mxu1 }
 0x6f1   : > { %v2387_v10 = vpop.f32.mrb[42].mxu1 }
 0x6f2   : > { %v2388_v11 = vadd.f32 %v2387_v10, %v2314_v6  ;;  %v3286_v19 = vpop.f32.mrb[43].mxu1 }
 0x716   : > { %v2461_v31 = vpop.f32.mrb[44].mxu1 }
 0x717   : > { %v2465_v8 = vadd.f32 %v2461_v31, %v2388_v11  ;;  %v3291_v2 = vpop.f32.mrb[45].mxu1 }
 0x71a   : > { %v2536_v9 = vpop.f32.mrb[46].mxu1 }
 0x71b   : > { %v2540_v62 = vadd.f32 %v2536_v9, %v2465_v8  ;;  %v3296_v20 = vpop.f32.mrb[47].mxu1 }
 0x71e   : > { %v2611_v13 = vpop.f32.mrb[48].mxu1 }
 0x71f   : > { %v2615_v21 = vadd.f32 %v2611_v13, %v2540_v62  ;;  %v3301_v12 = vpop.f32.mrb[49].mxu1 }
 0x722   : > { %v2686_v25 = vpop.f32.mrb[50].mxu1 }
 0x723   : > { %v2690_v33 = vadd.f32 %v2686_v25, %v2615_v21  ;;  %v3306_v30 = vpop.f32.mrb[51].mxu1 }
 0x726   : > { %v2761_v23 = vpop.f32.mrb[52].mxu1 }
 0x727   : > { %v2765_v22 = vadd.f32 %v2761_v23, %v2690_v33  ;;  %v3311_v61 = vpop.f32.mrb[53].mxu1 }
 0x72a   : > { %v2836_v36 = vpop.f32.mrb[54].mxu1 }
 0x72b   : > { %v2840_v39 = vadd.f32 %v2836_v36, %v2765_v22  ;;  %v3316_v40 = vpop.f32.mrb[55].mxu1 }
 0x72d   : > { %v2848_v41 = vadd.f32 %v3050_v37, %v2840_v39 }
 0x72f   : > { %v2849_v42 = vsel %vm1605_vm0, %v2848_v41, -inf }
 0x730   : > { %2850 = vmax.xlane.f32.xlu1 %v2849_v42 }
 0x7bd   : > { %v2851_v43 = vpop.xlane.xlu1 %2850 }
 0x7be   : > { %v2852_v28 = vsub.f32 %v2848_v41, %v2851_v43 }
 0x7c0   : > { %v2853_v32 = vmul.f32 1.442695, %v2852_v28 }
 0x7c2   : > { %3871 = vpow2.f32 %v2853_v32 }
 0x7cc   : > { %v3872_v45 = vpop.eup %3871 }
 0x7cd   : > { %v2855_v38 = vsel %vm1605_vm0, %v3872_v45, 0.0 }
 0x7ce   : > { %2856 = vadd.xlane.f32.xlu0 %v2855_v38 }
 0x85b   : > { %v2857_v0 = vpop.xlane.xlu0 %2856 }
 0x85c   : > { %3873 = vrcp.f32 %v2857_v0 }
 0x866   : > { %v3874_v1 = vpop.eup %3873 }
 0x867   : > { %v2859_v3 = vmul.f32 %v3874_v1, %v3872_v45 }
 0x869   : > { %2860 = vst.msk [vmem:[%s219_s23] sm:$0xff] %vm1605_vm0, %v2859_v3 }
 0x86a PF: > { %s15_s18 = sadd.s32 1, %s3881_s18  }
 0x86b   : > { %p12_p4 = scmp.ge.s32.totalorder %s15_s18, 6  }
 0x86d   :  { %14 = sbr.rel (!%p12_p4) target bundleno = 1 (0x1), region = 70 }

</bundles_post_ra>
